<compile_context>
chip_gen: v7x
topology: tpu7x:2x2x1
jax: 0.10.0
libtpu: 0.0.40
codegen_flags: <defaults>
</compile_context>

<pallas_src>
import jax
import jax.numpy as jnp
from jax.experimental import pallas as pl
from jax.experimental.pallas import tpu as pltpu


# ----------------------------------------------------------------------------
# Fused kernel (one grid step = one full GAT forward for one instance):
# bn1 (folded) -> LSTM -> bn2 -> graph attention -> residual -> fc -> fc_out -> sigmoid
# ----------------------------------------------------------------------------
def gat_kernel(x_ref, w_ref, v_ref, out_ref):
    # x_ref: (1, T, N, F)   w_ref: (F+3H, 4H)   v_ref: (8, 4H)   out_ref: (1, 1, N)
    _, T, N, F = x_ref.shape
    H = w_ref.shape[1] // 4

    # --- unpack parameter slabs (static slices of resident VMEM refs, no extra DMAs)
    w_ih = w_ref[0:F, :]                        # (F, 4H)
    w_hh = w_ref[F:F + H, :]                    # (H, 4H)
    w_t = w_ref[F + H:F + 2 * H, 0:H]           # (H, H)
    w_fc = w_ref[F + 2 * H:F + 3 * H, 0:H]      # (H, H)
    b = v_ref[0:1, :]                           # (1, 4H)  (b_ih + b_hh)
    b_t = v_ref[1:2, 0:H]                       # (1, H)
    a1 = v_ref[2:3, 0:H]                        # (1, H)
    a2 = v_ref[3:4, 0:H]                        # (1, H)
    b_fc = v_ref[4:5, 0:H]                      # (1, H)
    w_out = v_ref[5:6, 0:H]                     # (1, H)
    b_out = v_ref[6:7, 0:1]                     # (1, 1)

    # --- bn1 folded into the LSTM input projection (no normalized tensor materialized)
    xflat = x_ref[0].reshape(T * N, F)          # (T*N, F), layout-preserving, rows (t, n)
    mu = jnp.mean(xflat, axis=0, keepdims=True)                         # (1, F)
    var = jnp.mean(xflat * xflat, axis=0, keepdims=True) - mu * mu      # (1, F)
    inv = jax.lax.rsqrt(var + 1e-5)                                     # (1, F)
    b_tot = b - jnp.dot(mu * inv, w_ih, preferred_element_type=jnp.float32)     # (1, 4H)
    gx = jnp.dot(xflat * inv, w_ih, preferred_element_type=jnp.float32) + b_tot  # (T*N, 4H)

    # --- LSTM recurrence, fully unrolled (T static); gates stay in vregs, no scratch.
    h = jnp.zeros((N, H), jnp.float32)
    c = jnp.zeros((N, H), jnp.float32)
    for t in range(T):
        g = gx[t * N:(t + 1) * N, :] + jnp.dot(h, w_hh,
                                               preferred_element_type=jnp.float32)
        sg = jax.nn.sigmoid(g)                  # one full-width (N, 4H) EUP pass
        tg = jnp.tanh(g)                        # one full-width (N, 4H) EUP pass
        i_g = sg[:, 0:H]
        f_g = sg[:, H:2 * H]
        g_g = tg[:, 2 * H:3 * H]
        o_g = sg[:, 3 * H:4 * H]
        c = f_g * c + i_g * g_g
        h = o_g * jnp.tanh(c)

    # --- bn2 (batch stats over N samples, affine identity)
    mu2 = jnp.mean(h, axis=0, keepdims=True)
    var2 = jnp.mean((h - mu2) ** 2, axis=0, keepdims=True)
    hn = (h - mu2) * jax.lax.rsqrt(var2 + 1e-5)

    # --- cal_attention: scores[i, j] = a1 . xt[j] + a2 . xt[i]
    xt = jnp.dot(hn, w_t, preferred_element_type=jnp.float32) + b_t     # (N, H)
    s1 = jnp.sum(xt * a1, axis=-1, keepdims=True)                       # (N, 1)
    s2 = jnp.sum(xt * a2, axis=-1, keepdims=True)                       # (N, 1)
    scores = s2 + jnp.transpose(s1)                                     # (N, N)
    scores = jnp.where(scores > 0, scores, 0.01 * scores)               # LeakyReLU(0.01)
    scores = scores - jnp.max(scores, axis=1, keepdims=True)            # softmax over dim=1
    e = jnp.exp(scores)
    att = e * pl.reciprocal(jnp.sum(e, axis=1, keepdims=True), approx=True)

    # --- aggregate + residual + heads
    h2 = jnp.dot(att, hn, preferred_element_type=jnp.float32) + hn
    h3 = jnp.dot(h2, w_fc, preferred_element_type=jnp.float32) + b_fc
    h3 = jnp.where(h3 > 0, h3, 0.01 * h3)
    logits = jnp.sum(h3 * w_out, axis=-1, keepdims=True) + b_out        # (N, 1)
    out_ref[0] = jnp.transpose(jax.nn.sigmoid(logits))                  # (1, N), lane-dense


# ----------------------------------------------------------------------------
# One-time (outside the hot path) packing / layout prep
# ----------------------------------------------------------------------------
def pack_params(params):
    """Pack the 11 small parameter tensors into 2 lane-dense slabs (call once)."""
    H = params["w_hh"].shape[0]
    W4 = 4 * H

    def lane_pad(m):
        m = jnp.asarray(m, jnp.float32)
        return jnp.pad(m, ((0, 0), (0, W4 - m.shape[1])))

    w_slab = jnp.concatenate(
        [jnp.asarray(params["w_ih"], jnp.float32),
         jnp.asarray(params["w_hh"], jnp.float32),
         lane_pad(params["w_t"]),
         lane_pad(params["w_fc"])], axis=0)                      # (F + 3H, 4H)

    vec_rows = [params["b"], params["b_t"], params["a1"], params["a2"],
                params["b_fc"], params["w_out"], params["b_out"]]
    v_slab = jnp.concatenate(
        [lane_pad(jnp.asarray(r, jnp.float32).reshape(1, -1)) for r in vec_rows]
        + [jnp.zeros((1, W4), jnp.float32)], axis=0)             # (8, 4H)
    return w_slab, v_slab


def prepare_inputs(x_bnft):
    """One-time storage-layout change (outside the hot path): (B, N, F, T) -> (B, T, N, F)."""
    return jnp.transpose(jnp.asarray(x_bnft, jnp.float32), (0, 3, 1, 2))


# ----------------------------------------------------------------------------
# Batched forward: one grid step per instance
# ----------------------------------------------------------------------------
@jax.jit
def gat_forward(x_btnf, w_slab, v_slab):
    """x_btnf: (B, T, N, F) -> (B, N) sigmoid scores (independent GAT forward per b)."""
    B, T, N, F = x_btnf.shape
    out = pl.pallas_call(
        gat_kernel,
        out_shape=jax.ShapeDtypeStruct((B, 1, N), jnp.float32),
        grid=(B,),
        in_specs=[
            pl.BlockSpec((1, T, N, F), lambda b: (b, 0, 0, 0)),
            pl.BlockSpec(w_slab.shape, lambda b: (0, 0)),   # resident across the grid
            pl.BlockSpec(v_slab.shape, lambda b: (0, 0)),   # resident across the grid
        ],
        out_specs=pl.BlockSpec((1, 1, N), lambda b: (b, 0, 0)),
        compiler_params=pltpu.CompilerParams(
            dimension_semantics=("parallel",)),
    )(x_btnf, w_slab, v_slab)
    return out[:, 0, :]


# ----------------------------------------------------------------------------
# Pure-JAX reference (single instance), for correctness check
# ----------------------------------------------------------------------------
def gat_reference(x, params):
    """x: (N, F, T) -> (N,)"""
    H = params["w_hh"].shape[0]
    N = x.shape[0]
    mu = x.mean(axis=(0, 2), keepdims=True)
    var = ((x - mu) ** 2).mean(axis=(0, 2), keepdims=True)
    xn = (x - mu) / jnp.sqrt(var + 1e-5)
    xt = jnp.transpose(xn, (0, 2, 1))                    # (N, T, F)
    h = jnp.zeros((N, H), jnp.float32)
    c = jnp.zeros((N, H), jnp.float32)
    for t in range(xt.shape[1]):
        g = xt[:, t, :] @ params["w_ih"] + h @ params["w_hh"] + params["b"]
        i_g = jax.nn.sigmoid(g[:, :H]); f_g = jax.nn.sigmoid(g[:, H:2 * H])
        g_g = jnp.tanh(g[:, 2 * H:3 * H]); o_g = jax.nn.sigmoid(g[:, 3 * H:])
        c = f_g * c + i_g * g_g
        h = o_g * jnp.tanh(c)
    mu2 = h.mean(0, keepdims=True)
    var2 = ((h - mu2) ** 2).mean(0, keepdims=True)
    hn = (h - mu2) / jnp.sqrt(var2 + 1e-5)
    xtr = hn @ params["w_t"] + params["b_t"]
    s1 = (xtr * params["a1"]).sum(-1, keepdims=True)
    s2 = (xtr * params["a2"]).sum(-1, keepdims=True)
    scores = s2 + s1.T
    scores = jnp.where(scores > 0, scores, 0.01 * scores)
    att = jax.nn.softmax(scores, axis=1)
    h2 = att @ hn + hn
    h3 = h2 @ params["w_fc"] + params["b_fc"]
    h3 = jnp.where(h3 > 0, h3, 0.01 * h3)
    logits = (h3 * params["w_out"]).sum(-1, keepdims=True) + params["b_out"]
    return jax.nn.sigmoid(logits)[:, 0]


if __name__ == "__main__":
    B, N, F, T, H = 4, 8, 16, 8, 32    # batch of instances, samples, d_feat, seq_len, hidden
    key = jax.random.PRNGKey(0)
    ks = jax.random.split(key, 12)
    s = 0.1
    params = {
        "w_ih":  jax.random.normal(ks[0], (F, 4 * H), jnp.float32) * s,
        "w_hh":  jax.random.normal(ks[1], (H, 4 * H), jnp.float32) * s,
        "b":     jax.random.normal(ks[2], (1, 4 * H), jnp.float32) * s,  # b_ih + b_hh combined
        "w_t":   jax.random.normal(ks[3], (H, H), jnp.float32) * s,
        "b_t":   jax.random.normal(ks[4], (1, H), jnp.float32) * s,
        "a1":    jax.random.normal(ks[5], (1, H), jnp.float32) * s,      # a[:H].T  (row)
        "a2":    jax.random.normal(ks[6], (1, H), jnp.float32) * s,      # a[H:].T  (row)
        "w_fc":  jax.random.normal(ks[7], (H, H), jnp.float32) * s,
        "b_fc":  jax.random.normal(ks[8], (1, H), jnp.float32) * s,
        "w_out": jax.random.normal(ks[9], (1, H), jnp.float32) * s,      # fc_out weight (row)
        "b_out": jax.random.normal(ks[10], (1, 1), jnp.float32) * s,
    }
    x = jax.random.normal(ks[11], (B, N, F, T), jnp.float32)   # module-native layout

    w_slab, v_slab = pack_params(params)   # once, outside the hot path
    x_t = prepare_inputs(x)                # once, outside the hot path

    out = jax.block_until_ready(gat_forward(x_t, w_slab, v_slab))   # (B, N)
    ref = jax.block_until_ready(jax.vmap(lambda xb: gat_reference(xb, params))(x))

    assert out.shape == (B, N), out.shape
    # tolerance 2e-3: pl.reciprocal(approx=True) in the softmax and the folded-bn variance
    # form introduce ~1e-4-level relative error (well inside this bound after propagation).
    assert jnp.allclose(out, ref, rtol=2e-3, atol=2e-3), (out, ref)
    print("KERNEL_OK")
</pallas_src>

<mosaic_0001>
module attributes {stable_mosaic.version = 11 : i64} {
  func.func @gat_kernel(%arg0: i32, %arg1: memref<1x8x8x16xf32, #tpu.memory_space<vmem>>, %arg2: memref<112x128xf32, #tpu.memory_space<vmem>>, %arg3: memref<8x128xf32, #tpu.memory_space<vmem>>, %arg4: memref<1x1x8xf32, #tpu.memory_space<vmem>>) attributes {dimension_semantics = [#tpu.dimension_semantics<parallel>], iteration_bounds = array<i64: 4>, scalar_prefetch = 0 : i64, scratch_operands = 0 : i64, tpu.core_type = #tpu.core_type<tc>, window_params = [{transform_indices = @transform_0, window_bounds = array<i64: 1, 8, 8, 16>}, {pipeline_mode = #tpu.pipeline_mode<synchronous>, transform_indices = @transform_1, window_bounds = array<i64: 112, 128>}, {pipeline_mode = #tpu.pipeline_mode<synchronous>, transform_indices = @transform_2, window_bounds = array<i64: 8, 128>}, {transform_indices = @transform_3, window_bounds = array<i64: 1, 1, 8>}]} {
    %c0 = arith.constant 0 : index
    %c0_0 = arith.constant 0 : index
    %0 = vector.load %arg2[%c0, %c0_0] : memref<112x128xf32, #tpu.memory_space<vmem>>, vector<16x128xf32>
    %c16 = arith.constant 16 : index
    %c0_1 = arith.constant 0 : index
    %1 = vector.load %arg2[%c16, %c0_1] : memref<112x128xf32, #tpu.memory_space<vmem>>, vector<32x128xf32>
    %c48 = arith.constant 48 : index
    %c0_2 = arith.constant 0 : index
    %2 = vector.load %arg2[%c48, %c0_2] : memref<112x128xf32, #tpu.memory_space<vmem>>, vector<32x32xf32>
    %c80 = arith.constant 80 : index
    %c0_3 = arith.constant 0 : index
    %3 = vector.load %arg2[%c80, %c0_3] : memref<112x128xf32, #tpu.memory_space<vmem>>, vector<32x32xf32>
    %c0_4 = arith.constant 0 : index
    %c0_5 = arith.constant 0 : index
    %4 = vector.load %arg3[%c0_4, %c0_5] : memref<8x128xf32, #tpu.memory_space<vmem>>, vector<1x128xf32>
    %c1 = arith.constant 1 : index
    %c0_6 = arith.constant 0 : index
    %5 = vector.load %arg3[%c1, %c0_6] : memref<8x128xf32, #tpu.memory_space<vmem>>, vector<1x32xf32>
    %c2 = arith.constant 2 : index
    %c0_7 = arith.constant 0 : index
    %6 = vector.load %arg3[%c2, %c0_7] : memref<8x128xf32, #tpu.memory_space<vmem>>, vector<1x32xf32>
    %c3 = arith.constant 3 : index
    %c0_8 = arith.constant 0 : index
    %7 = vector.load %arg3[%c3, %c0_8] : memref<8x128xf32, #tpu.memory_space<vmem>>, vector<1x32xf32>
    %c4 = arith.constant 4 : index
    %c0_9 = arith.constant 0 : index
    %8 = vector.load %arg3[%c4, %c0_9] : memref<8x128xf32, #tpu.memory_space<vmem>>, vector<1x32xf32>
    %c5 = arith.constant 5 : index
    %c0_10 = arith.constant 0 : index
    %9 = vector.load %arg3[%c5, %c0_10] : memref<8x128xf32, #tpu.memory_space<vmem>>, vector<1x32xf32>
    %c6 = arith.constant 6 : index
    %c0_11 = arith.constant 0 : index
    %10 = vector.load %arg3[%c6, %c0_11] : memref<8x128xf32, #tpu.memory_space<vmem>>, vector<1x1xf32>
    %c0_12 = arith.constant 0 : index
    %c0_13 = arith.constant 0 : index
    %c0_14 = arith.constant 0 : index
    %c0_15 = arith.constant 0 : index
    %11 = vector.load %arg1[%c0_12, %c0_13, %c0_14, %c0_15] : memref<1x8x8x16xf32, #tpu.memory_space<vmem>>, vector<1x8x8x16xf32>
    %12 = vector.shape_cast %11 : vector<1x8x8x16xf32> to vector<8x8x16xf32>
    %13 = vector.shape_cast %12 : vector<8x8x16xf32> to vector<64x16xf32>
    %cst = arith.constant dense<0.000000e+00> : vector<16xf32>
    %14 = vector.multi_reduction <add>, %13, %cst [0] : vector<64x16xf32> to vector<16xf32>
    %15 = vector.shape_cast %14 : vector<16xf32> to vector<1x16xf32>
    %cst_16 = arith.constant 6.400000e+01 : f32
    %16 = vector.broadcast %cst_16 : f32 to vector<1x16xf32>
    %17 = arith.divf %15, %16 : vector<1x16xf32>
    %18 = arith.mulf %13, %13 : vector<64x16xf32>
    %cst_17 = arith.constant dense<0.000000e+00> : vector<16xf32>
    %19 = vector.multi_reduction <add>, %18, %cst_17 [0] : vector<64x16xf32> to vector<16xf32>
    %20 = vector.shape_cast %19 : vector<16xf32> to vector<1x16xf32>
    %cst_18 = arith.constant 6.400000e+01 : f32
    %21 = vector.broadcast %cst_18 : f32 to vector<1x16xf32>
    %22 = arith.divf %20, %21 : vector<1x16xf32>
    %23 = arith.mulf %17, %17 : vector<1x16xf32>
    %24 = arith.subf %22, %23 : vector<1x16xf32>
    %cst_19 = arith.constant 9.99999974E-6 : f32
    %25 = vector.broadcast %cst_19 : f32 to vector<1x16xf32>
    %26 = arith.addf %24, %25 : vector<1x16xf32>
    %27 = math.rsqrt %26 : vector<1x16xf32>
    %28 = arith.mulf %17, %27 : vector<1x16xf32>
    %cst_20 = arith.constant dense<0.000000e+00> : vector<1x128xf32>
    %29 = tpu.matmul %28, %0, %cst_20 {dimension_numbers = #tpu.dot_dimension_numbers<[1], [0], [0], [1], [0, 0, 1, 1], [], []>} : vector<1x16xf32>, vector<16x128xf32>, vector<1x128xf32> -> vector<1x128xf32>
    %30 = arith.subf %4, %29 : vector<1x128xf32>
    %31 = vector.broadcast %27 : vector<1x16xf32> to vector<64x16xf32>
    %32 = arith.mulf %13, %31 : vector<64x16xf32>
    %cst_21 = arith.constant dense<0.000000e+00> : vector<64x128xf32>
    %33 = tpu.matmul %32, %0, %cst_21 {dimension_numbers = #tpu.dot_dimension_numbers<[1], [0], [0], [1], [0, 0, 1, 1], [], []>} : vector<64x16xf32>, vector<16x128xf32>, vector<64x128xf32> -> vector<64x128xf32>
    %34 = vector.broadcast %30 : vector<1x128xf32> to vector<64x128xf32>
    %35 = arith.addf %33, %34 : vector<64x128xf32>
    %cst_22 = arith.constant 0.000000e+00 : f32
    %36 = vector.broadcast %cst_22 : f32 to vector<8x32xf32>
    %cst_23 = arith.constant 0.000000e+00 : f32
    %37 = vector.broadcast %cst_23 : f32 to vector<8x32xf32>
    %38 = vector.extract_strided_slice %35 {offsets = [0, 0], sizes = [8, 128], strides = [1, 1]} : vector<64x128xf32> to vector<8x128xf32>
    %cst_24 = arith.constant dense<0.000000e+00> : vector<8x128xf32>
    %39 = tpu.matmul %36, %1, %cst_24 {dimension_numbers = #tpu.dot_dimension_numbers<[1], [0], [0], [1], [0, 0, 1, 1], [], []>} : vector<8x32xf32>, vector<32x128xf32>, vector<8x128xf32> -> vector<8x128xf32>
    %40 = arith.addf %38, %39 : vector<8x128xf32>
    %41 = arith.negf %40 : vector<8x128xf32>
    %42 = math.exp %41 : vector<8x128xf32>
    %cst_25 = arith.constant 1.000000e+00 : f32
    %43 = vector.broadcast %cst_25 : f32 to vector<8x128xf32>
    %44 = arith.addf %43, %42 : vector<8x128xf32>
    %45 = arith.divf %43, %44 : vector<8x128xf32>
    %46 = math.tanh %40 : vector<8x128xf32>
    %47 = vector.extract_strided_slice %45 {offsets = [0, 0], sizes = [8, 32], strides = [1, 1]} : vector<8x128xf32> to vector<8x32xf32>
    %48 = vector.extract_strided_slice %45 {offsets = [0, 32], sizes = [8, 32], strides = [1, 1]} : vector<8x128xf32> to vector<8x32xf32>
    %49 = vector.extract_strided_slice %46 {offsets = [0, 64], sizes = [8, 32], strides = [1, 1]} : vector<8x128xf32> to vector<8x32xf32>
    %50 = vector.extract_strided_slice %45 {offsets = [0, 96], sizes = [8, 32], strides = [1, 1]} : vector<8x128xf32> to vector<8x32xf32>
    %51 = arith.mulf %48, %37 : vector<8x32xf32>
    %52 = arith.mulf %47, %49 : vector<8x32xf32>
    %53 = arith.addf %51, %52 : vector<8x32xf32>
    %54 = math.tanh %53 : vector<8x32xf32>
    %55 = arith.mulf %50, %54 : vector<8x32xf32>
    %56 = vector.extract_strided_slice %35 {offsets = [8, 0], sizes = [8, 128], strides = [1, 1]} : vector<64x128xf32> to vector<8x128xf32>
    %cst_26 = arith.constant dense<0.000000e+00> : vector<8x128xf32>
    %57 = tpu.matmul %55, %1, %cst_26 {dimension_numbers = #tpu.dot_dimension_numbers<[1], [0], [0], [1], [0, 0, 1, 1], [], []>} : vector<8x32xf32>, vector<32x128xf32>, vector<8x128xf32> -> vector<8x128xf32>
    %58 = arith.addf %56, %57 : vector<8x128xf32>
    %59 = arith.negf %58 : vector<8x128xf32>
    %60 = math.exp %59 : vector<8x128xf32>
    %cst_27 = arith.constant 1.000000e+00 : f32
    %61 = vector.broadcast %cst_27 : f32 to vector<8x128xf32>
    %62 = arith.addf %61, %60 : vector<8x128xf32>
    %63 = arith.divf %61, %62 : vector<8x128xf32>
    %64 = math.tanh %58 : vector<8x128xf32>
    %65 = vector.extract_strided_slice %63 {offsets = [0, 0], sizes = [8, 32], strides = [1, 1]} : vector<8x128xf32> to vector<8x32xf32>
    %66 = vector.extract_strided_slice %63 {offsets = [0, 32], sizes = [8, 32], strides = [1, 1]} : vector<8x128xf32> to vector<8x32xf32>
    %67 = vector.extract_strided_slice %64 {offsets = [0, 64], sizes = [8, 32], strides = [1, 1]} : vector<8x128xf32> to vector<8x32xf32>
    %68 = vector.extract_strided_slice %63 {offsets = [0, 96], sizes = [8, 32], strides = [1, 1]} : vector<8x128xf32> to vector<8x32xf32>
    %69 = arith.mulf %66, %53 : vector<8x32xf32>
    %70 = arith.mulf %65, %67 : vector<8x32xf32>
    %71 = arith.addf %69, %70 : vector<8x32xf32>
    %72 = math.tanh %71 : vector<8x32xf32>
    %73 = arith.mulf %68, %72 : vector<8x32xf32>
    %74 = vector.extract_strided_slice %35 {offsets = [16, 0], sizes = [8, 128], strides = [1, 1]} : vector<64x128xf32> to vector<8x128xf32>
    %cst_28 = arith.constant dense<0.000000e+00> : vector<8x128xf32>
    %75 = tpu.matmul %73, %1, %cst_28 {dimension_numbers = #tpu.dot_dimension_numbers<[1], [0], [0], [1], [0, 0, 1, 1], [], []>} : vector<8x32xf32>, vector<32x128xf32>, vector<8x128xf32> -> vector<8x128xf32>
    %76 = arith.addf %74, %75 : vector<8x128xf32>
    %77 = arith.negf %76 : vector<8x128xf32>
    %78 = math.exp %77 : vector<8x128xf32>
    %cst_29 = arith.constant 1.000000e+00 : f32
    %79 = vector.broadcast %cst_29 : f32 to vector<8x128xf32>
    %80 = arith.addf %79, %78 : vector<8x128xf32>
    %81 = arith.divf %79, %80 : vector<8x128xf32>
    %82 = math.tanh %76 : vector<8x128xf32>
    %83 = vector.extract_strided_slice %81 {offsets = [0, 0], sizes = [8, 32], strides = [1, 1]} : vector<8x128xf32> to vector<8x32xf32>
    %84 = vector.extract_strided_slice %81 {offsets = [0, 32], sizes = [8, 32], strides = [1, 1]} : vector<8x128xf32> to vector<8x32xf32>
    %85 = vector.extract_strided_slice %82 {offsets = [0, 64], sizes = [8, 32], strides = [1, 1]} : vector<8x128xf32> to vector<8x32xf32>
    %86 = vector.extract_strided_slice %81 {offsets = [0, 96], sizes = [8, 32], strides = [1, 1]} : vector<8x128xf32> to vector<8x32xf32>
    %87 = arith.mulf %84, %71 : vector<8x32xf32>
    %88 = arith.mulf %83, %85 : vector<8x32xf32>
    %89 = arith.addf %87, %88 : vector<8x32xf32>
    %90 = math.tanh %89 : vector<8x32xf32>
    %91 = arith.mulf %86, %90 : vector<8x32xf32>
    %92 = vector.extract_strided_slice %35 {offsets = [24, 0], sizes = [8, 128], strides = [1, 1]} : vector<64x128xf32> to vector<8x128xf32>
    %cst_30 = arith.constant dense<0.000000e+00> : vector<8x128xf32>
    %93 = tpu.matmul %91, %1, %cst_30 {dimension_numbers = #tpu.dot_dimension_numbers<[1], [0], [0], [1], [0, 0, 1, 1], [], []>} : vector<8x32xf32>, vector<32x128xf32>, vector<8x128xf32> -> vector<8x128xf32>
    %94 = arith.addf %92, %93 : vector<8x128xf32>
    %95 = arith.negf %94 : vector<8x128xf32>
    %96 = math.exp %95 : vector<8x128xf32>
    %cst_31 = arith.constant 1.000000e+00 : f32
    %97 = vector.broadcast %cst_31 : f32 to vector<8x128xf32>
    %98 = arith.addf %97, %96 : vector<8x128xf32>
    %99 = arith.divf %97, %98 : vector<8x128xf32>
    %100 = math.tanh %94 : vector<8x128xf32>
    %101 = vector.extract_strided_slice %99 {offsets = [0, 0], sizes = [8, 32], strides = [1, 1]} : vector<8x128xf32> to vector<8x32xf32>
    %102 = vector.extract_strided_slice %99 {offsets = [0, 32], sizes = [8, 32], strides = [1, 1]} : vector<8x128xf32> to vector<8x32xf32>
    %103 = vector.extract_strided_slice %100 {offsets = [0, 64], sizes = [8, 32], strides = [1, 1]} : vector<8x128xf32> to vector<8x32xf32>
    %104 = vector.extract_strided_slice %99 {offsets = [0, 96], sizes = [8, 32], strides = [1, 1]} : vector<8x128xf32> to vector<8x32xf32>
    %105 = arith.mulf %102, %89 : vector<8x32xf32>
    %106 = arith.mulf %101, %103 : vector<8x32xf32>
    %107 = arith.addf %105, %106 : vector<8x32xf32>
    %108 = math.tanh %107 : vector<8x32xf32>
    %109 = arith.mulf %104, %108 : vector<8x32xf32>
    %110 = vector.extract_strided_slice %35 {offsets = [32, 0], sizes = [8, 128], strides = [1, 1]} : vector<64x128xf32> to vector<8x128xf32>
    %cst_32 = arith.constant dense<0.000000e+00> : vector<8x128xf32>
    %111 = tpu.matmul %109, %1, %cst_32 {dimension_numbers = #tpu.dot_dimension_numbers<[1], [0], [0], [1], [0, 0, 1, 1], [], []>} : vector<8x32xf32>, vector<32x128xf32>, vector<8x128xf32> -> vector<8x128xf32>
    %112 = arith.addf %110, %111 : vector<8x128xf32>
    %113 = arith.negf %112 : vector<8x128xf32>
    %114 = math.exp %113 : vector<8x128xf32>
    %cst_33 = arith.constant 1.000000e+00 : f32
    %115 = vector.broadcast %cst_33 : f32 to vector<8x128xf32>
    %116 = arith.addf %115, %114 : vector<8x128xf32>
    %117 = arith.divf %115, %116 : vector<8x128xf32>
    %118 = math.tanh %112 : vector<8x128xf32>
    %119 = vector.extract_strided_slice %117 {offsets = [0, 0], sizes = [8, 32], strides = [1, 1]} : vector<8x128xf32> to vector<8x32xf32>
    %120 = vector.extract_strided_slice %117 {offsets = [0, 32], sizes = [8, 32], strides = [1, 1]} : vector<8x128xf32> to vector<8x32xf32>
    %121 = vector.extract_strided_slice %118 {offsets = [0, 64], sizes = [8, 32], strides = [1, 1]} : vector<8x128xf32> to vector<8x32xf32>
    %122 = vector.extract_strided_slice %117 {offsets = [0, 96], sizes = [8, 32], strides = [1, 1]} : vector<8x128xf32> to vector<8x32xf32>
    %123 = arith.mulf %120, %107 : vector<8x32xf32>
    %124 = arith.mulf %119, %121 : vector<8x32xf32>
    %125 = arith.addf %123, %124 : vector<8x32xf32>
    %126 = math.tanh %125 : vector<8x32xf32>
    %127 = arith.mulf %122, %126 : vector<8x32xf32>
    %128 = vector.extract_strided_slice %35 {offsets = [40, 0], sizes = [8, 128], strides = [1, 1]} : vector<64x128xf32> to vector<8x128xf32>
    %cst_34 = arith.constant dense<0.000000e+00> : vector<8x128xf32>
    %129 = tpu.matmul %127, %1, %cst_34 {dimension_numbers = #tpu.dot_dimension_numbers<[1], [0], [0], [1], [0, 0, 1, 1], [], []>} : vector<8x32xf32>, vector<32x128xf32>, vector<8x128xf32> -> vector<8x128xf32>
    %130 = arith.addf %128, %129 : vector<8x128xf32>
    %131 = arith.negf %130 : vector<8x128xf32>
    %132 = math.exp %131 : vector<8x128xf32>
    %cst_35 = arith.constant 1.000000e+00 : f32
    %133 = vector.broadcast %cst_35 : f32 to vector<8x128xf32>
    %134 = arith.addf %133, %132 : vector<8x128xf32>
    %135 = arith.divf %133, %134 : vector<8x128xf32>
    %136 = math.tanh %130 : vector<8x128xf32>
    %137 = vector.extract_strided_slice %135 {offsets = [0, 0], sizes = [8, 32], strides = [1, 1]} : vector<8x128xf32> to vector<8x32xf32>
    %138 = vector.extract_strided_slice %135 {offsets = [0, 32], sizes = [8, 32], strides = [1, 1]} : vector<8x128xf32> to vector<8x32xf32>
    %139 = vector.extract_strided_slice %136 {offsets = [0, 64], sizes = [8, 32], strides = [1, 1]} : vector<8x128xf32> to vector<8x32xf32>
    %140 = vector.extract_strided_slice %135 {offsets = [0, 96], sizes = [8, 32], strides = [1, 1]} : vector<8x128xf32> to vector<8x32xf32>
    %141 = arith.mulf %138, %125 : vector<8x32xf32>
    %142 = arith.mulf %137, %139 : vector<8x32xf32>
    %143 = arith.addf %141, %142 : vector<8x32xf32>
    %144 = math.tanh %143 : vector<8x32xf32>
    %145 = arith.mulf %140, %144 : vector<8x32xf32>
    %146 = vector.extract_strided_slice %35 {offsets = [48, 0], sizes = [8, 128], strides = [1, 1]} : vector<64x128xf32> to vector<8x128xf32>
    %cst_36 = arith.constant dense<0.000000e+00> : vector<8x128xf32>
    %147 = tpu.matmul %145, %1, %cst_36 {dimension_numbers = #tpu.dot_dimension_numbers<[1], [0], [0], [1], [0, 0, 1, 1], [], []>} : vector<8x32xf32>, vector<32x128xf32>, vector<8x128xf32> -> vector<8x128xf32>
    %148 = arith.addf %146, %147 : vector<8x128xf32>
    %149 = arith.negf %148 : vector<8x128xf32>
    %150 = math.exp %149 : vector<8x128xf32>
    %cst_37 = arith.constant 1.000000e+00 : f32
    %151 = vector.broadcast %cst_37 : f32 to vector<8x128xf32>
    %152 = arith.addf %151, %150 : vector<8x128xf32>
    %153 = arith.divf %151, %152 : vector<8x128xf32>
    %154 = math.tanh %148 : vector<8x128xf32>
    %155 = vector.extract_strided_slice %153 {offsets = [0, 0], sizes = [8, 32], strides = [1, 1]} : vector<8x128xf32> to vector<8x32xf32>
    %156 = vector.extract_strided_slice %153 {offsets = [0, 32], sizes = [8, 32], strides = [1, 1]} : vector<8x128xf32> to vector<8x32xf32>
    %157 = vector.extract_strided_slice %154 {offsets = [0, 64], sizes = [8, 32], strides = [1, 1]} : vector<8x128xf32> to vector<8x32xf32>
    %158 = vector.extract_strided_slice %153 {offsets = [0, 96], sizes = [8, 32], strides = [1, 1]} : vector<8x128xf32> to vector<8x32xf32>
    %159 = arith.mulf %156, %143 : vector<8x32xf32>
    %160 = arith.mulf %155, %157 : vector<8x32xf32>
    %161 = arith.addf %159, %160 : vector<8x32xf32>
    %162 = math.tanh %161 : vector<8x32xf32>
    %163 = arith.mulf %158, %162 : vector<8x32xf32>
    %164 = vector.extract_strided_slice %35 {offsets = [56, 0], sizes = [8, 128], strides = [1, 1]} : vector<64x128xf32> to vector<8x128xf32>
    %cst_38 = arith.constant dense<0.000000e+00> : vector<8x128xf32>
    %165 = tpu.matmul %163, %1, %cst_38 {dimension_numbers = #tpu.dot_dimension_numbers<[1], [0], [0], [1], [0, 0, 1, 1], [], []>} : vector<8x32xf32>, vector<32x128xf32>, vector<8x128xf32> -> vector<8x128xf32>
    %166 = arith.addf %164, %165 : vector<8x128xf32>
    %167 = arith.negf %166 : vector<8x128xf32>
    %168 = math.exp %167 : vector<8x128xf32>
    %cst_39 = arith.constant 1.000000e+00 : f32
    %169 = vector.broadcast %cst_39 : f32 to vector<8x128xf32>
    %170 = arith.addf %169, %168 : vector<8x128xf32>
    %171 = arith.divf %169, %170 : vector<8x128xf32>
    %172 = math.tanh %166 : vector<8x128xf32>
    %173 = vector.extract_strided_slice %171 {offsets = [0, 0], sizes = [8, 32], strides = [1, 1]} : vector<8x128xf32> to vector<8x32xf32>
    %174 = vector.extract_strided_slice %171 {offsets = [0, 32], sizes = [8, 32], strides = [1, 1]} : vector<8x128xf32> to vector<8x32xf32>
    %175 = vector.extract_strided_slice %172 {offsets = [0, 64], sizes = [8, 32], strides = [1, 1]} : vector<8x128xf32> to vector<8x32xf32>
    %176 = vector.extract_strided_slice %171 {offsets = [0, 96], sizes = [8, 32], strides = [1, 1]} : vector<8x128xf32> to vector<8x32xf32>
    %177 = arith.mulf %174, %161 : vector<8x32xf32>
    %178 = arith.mulf %173, %175 : vector<8x32xf32>
    %179 = arith.addf %177, %178 : vector<8x32xf32>
    %180 = math.tanh %179 : vector<8x32xf32>
    %181 = arith.mulf %176, %180 : vector<8x32xf32>
    %cst_40 = arith.constant dense<0.000000e+00> : vector<32xf32>
    %182 = vector.multi_reduction <add>, %181, %cst_40 [0] : vector<8x32xf32> to vector<32xf32>
    %183 = vector.shape_cast %182 : vector<32xf32> to vector<1x32xf32>
    %cst_41 = arith.constant 8.000000e+00 : f32
    %184 = vector.broadcast %cst_41 : f32 to vector<1x32xf32>
    %185 = arith.divf %183, %184 : vector<1x32xf32>
    %186 = vector.broadcast %185 : vector<1x32xf32> to vector<8x32xf32>
    %187 = arith.subf %181, %186 : vector<8x32xf32>
    %188 = arith.mulf %187, %187 : vector<8x32xf32>
    %cst_42 = arith.constant dense<0.000000e+00> : vector<32xf32>
    %189 = vector.multi_reduction <add>, %188, %cst_42 [0] : vector<8x32xf32> to vector<32xf32>
    %190 = vector.shape_cast %189 : vector<32xf32> to vector<1x32xf32>
    %cst_43 = arith.constant 8.000000e+00 : f32
    %191 = vector.broadcast %cst_43 : f32 to vector<1x32xf32>
    %192 = arith.divf %190, %191 : vector<1x32xf32>
    %193 = vector.broadcast %185 : vector<1x32xf32> to vector<8x32xf32>
    %194 = arith.subf %181, %193 : vector<8x32xf32>
    %cst_44 = arith.constant 9.99999974E-6 : f32
    %195 = vector.broadcast %cst_44 : f32 to vector<1x32xf32>
    %196 = arith.addf %192, %195 : vector<1x32xf32>
    %197 = math.rsqrt %196 : vector<1x32xf32>
    %198 = vector.broadcast %197 : vector<1x32xf32> to vector<8x32xf32>
    %199 = arith.mulf %194, %198 : vector<8x32xf32>
    %cst_45 = arith.constant dense<0.000000e+00> : vector<8x32xf32>
    %200 = tpu.matmul %199, %2, %cst_45 {dimension_numbers = #tpu.dot_dimension_numbers<[1], [0], [0], [1], [0, 0, 1, 1], [], []>} : vector<8x32xf32>, vector<32x32xf32>, vector<8x32xf32> -> vector<8x32xf32>
    %201 = vector.broadcast %5 : vector<1x32xf32> to vector<8x32xf32>
    %202 = arith.addf %200, %201 : vector<8x32xf32>
    %203 = vector.broadcast %6 : vector<1x32xf32> to vector<8x32xf32>
    %204 = arith.mulf %202, %203 : vector<8x32xf32>
    %cst_46 = arith.constant dense<0.000000e+00> : vector<8xf32>
    %205 = vector.multi_reduction <add>, %204, %cst_46 [1] : vector<8x32xf32> to vector<8xf32>
    %206 = vector.shape_cast %205 : vector<8xf32> to vector<8x1xf32>
    %207 = vector.broadcast %7 : vector<1x32xf32> to vector<8x32xf32>
    %208 = arith.mulf %202, %207 : vector<8x32xf32>
    %cst_47 = arith.constant dense<0.000000e+00> : vector<8xf32>
    %209 = vector.multi_reduction <add>, %208, %cst_47 [1] : vector<8x32xf32> to vector<8xf32>
    %210 = vector.shape_cast %209 : vector<8xf32> to vector<8x1xf32>
    %211 = tpu.transpose %206, [1, 0] : vector<8x1xf32> -> vector<1x8xf32>
    %212 = vector.broadcast %210 : vector<8x1xf32> to vector<8x8xf32>
    %213 = vector.broadcast %211 : vector<1x8xf32> to vector<8x8xf32>
    %214 = arith.addf %212, %213 : vector<8x8xf32>
    %cst_48 = arith.constant 0.000000e+00 : f32
    %215 = vector.broadcast %cst_48 : f32 to vector<8x8xf32>
    %216 = arith.cmpf ogt, %214, %215 : vector<8x8xf32>
    %cst_49 = arith.constant 0.00999999977 : f32
    %217 = vector.broadcast %cst_49 : f32 to vector<8x8xf32>
    %218 = arith.mulf %217, %214 : vector<8x8xf32>
    %219 = arith.select %216, %214, %218 : vector<8x8xi1>, vector<8x8xf32>
    %cst_50 = arith.constant dense<0xFF800000> : vector<8xf32>
    %220 = vector.multi_reduction <maximumf>, %219, %cst_50 [1] : vector<8x8xf32> to vector<8xf32>
    %221 = vector.shape_cast %220 : vector<8xf32> to vector<8x1xf32>
    %222 = vector.broadcast %221 : vector<8x1xf32> to vector<8x8xf32>
    %223 = arith.subf %219, %222 : vector<8x8xf32>
    %224 = math.exp %223 : vector<8x8xf32>
    %cst_51 = arith.constant dense<0.000000e+00> : vector<8xf32>
    %225 = vector.multi_reduction <add>, %224, %cst_51 [1] : vector<8x8xf32> to vector<8xf32>
    %226 = vector.shape_cast %225 : vector<8xf32> to vector<8x1xf32>
    %227 = tpu.reciprocal %226 {approx = true} : vector<8x1xf32> -> vector<8x1xf32>
    %228 = vector.broadcast %227 : vector<8x1xf32> to vector<8x8xf32>
    %229 = arith.mulf %224, %228 : vector<8x8xf32>
    %cst_52 = arith.constant dense<0.000000e+00> : vector<8x32xf32>
    %230 = tpu.matmul %229, %199, %cst_52 {dimension_numbers = #tpu.dot_dimension_numbers<[1], [0], [0], [1], [0, 0, 1, 1], [], []>} : vector<8x8xf32>, vector<8x32xf32>, vector<8x32xf32> -> vector<8x32xf32>
    %231 = arith.addf %230, %199 : vector<8x32xf32>
    %cst_53 = arith.constant dense<0.000000e+00> : vector<8x32xf32>
    %232 = tpu.matmul %231, %3, %cst_53 {dimension_numbers = #tpu.dot_dimension_numbers<[1], [0], [0], [1], [0, 0, 1, 1], [], []>} : vector<8x32xf32>, vector<32x32xf32>, vector<8x32xf32> -> vector<8x32xf32>
    %233 = vector.broadcast %8 : vector<1x32xf32> to vector<8x32xf32>
    %234 = arith.addf %232, %233 : vector<8x32xf32>
    %cst_54 = arith.constant 0.000000e+00 : f32
    %235 = vector.broadcast %cst_54 : f32 to vector<8x32xf32>
    %236 = arith.cmpf ogt, %234, %235 : vector<8x32xf32>
    %cst_55 = arith.constant 0.00999999977 : f32
    %237 = vector.broadcast %cst_55 : f32 to vector<8x32xf32>
    %238 = arith.mulf %237, %234 : vector<8x32xf32>
    %239 = arith.select %236, %234, %238 : vector<8x32xi1>, vector<8x32xf32>
    %240 = vector.broadcast %9 : vector<1x32xf32> to vector<8x32xf32>
    %241 = arith.mulf %239, %240 : vector<8x32xf32>
    %cst_56 = arith.constant dense<0.000000e+00> : vector<8xf32>
    %242 = vector.multi_reduction <add>, %241, %cst_56 [1] : vector<8x32xf32> to vector<8xf32>
    %243 = vector.shape_cast %242 : vector<8xf32> to vector<8x1xf32>
    %244 = vector.broadcast %10 : vector<1x1xf32> to vector<8x1xf32>
    %245 = arith.addf %243, %244 : vector<8x1xf32>
    %246 = arith.negf %245 : vector<8x1xf32>
    %247 = math.exp %246 : vector<8x1xf32>
    %cst_57 = arith.constant 1.000000e+00 : f32
    %248 = vector.broadcast %cst_57 : f32 to vector<8x1xf32>
    %249 = arith.addf %248, %247 : vector<8x1xf32>
    %250 = arith.divf %248, %249 : vector<8x1xf32>
    %251 = tpu.transpose %250, [1, 0] : vector<8x1xf32> -> vector<1x8xf32>
    %c0_58 = arith.constant 0 : index
    %c0_59 = arith.constant 0 : index
    %c0_60 = arith.constant 0 : index
    %252 = vector.load %arg4[%c0_58, %c0_59, %c0_60] : memref<1x1x8xf32, #tpu.memory_space<vmem>>, vector<1x1x8xf32>
    %253 = vector.shape_cast %252 : vector<1x1x8xf32> to vector<1x8xf32>
    %254 = vector.shape_cast %251 : vector<1x8xf32> to vector<1x1x8xf32>
    tpu.vector_store %arg4[%c0_58, %c0_59, %c0_60], %254 {strides = array<i32>} : memref<1x1x8xf32, #tpu.memory_space<vmem>>, vector<1x1x8xf32>,
    return
  }
  func.func @transform_0(%arg0: i32) -> (i32, i32, i32, i32) {
    %c0_i32 = arith.constant 0 : i32
    %c0_i32_0 = arith.constant 0 : i32
    %c0_i32_1 = arith.constant 0 : i32
    %c0_i32_2 = arith.constant 0 : i32
    return %arg0, %c0_i32, %c0_i32_0, %c0_i32_1 : i32, i32, i32, i32
  }
  func.func @transform_1(%arg0: i32) -> (i32, i32) {
    %c0_i32 = arith.constant 0 : i32
    %c0_i32_0 = arith.constant 0 : i32
    %c0_i32_1 = arith.constant 0 : i32
    return %c0_i32, %c0_i32_0 : i32, i32
  }
  func.func @transform_2(%arg0: i32) -> (i32, i32) {
    %c0_i32 = arith.constant 0 : i32
    %c0_i32_0 = arith.constant 0 : i32
    %c0_i32_1 = arith.constant 0 : i32
    return %c0_i32, %c0_i32_0 : i32, i32
  }
  func.func @transform_3(%arg0: i32) -> (i32, i32, i32) {
    %c0_i32 = arith.constant 0 : i32
    %c0_i32_0 = arith.constant 0 : i32
    %c0_i32_1 = arith.constant 0 : i32
    return %arg0, %c0_i32, %c0_i32_0 : i32, i32, i32
  }
}

</mosaic_0001>

<bundles_post_ra>
// kernel: gat_forward.1
= control target key start
LH: loop header
LB: loop body
LE: loop exit
PB: predicated region body
PF: predicated region fallthrough
CT: control target
= control target key end

     0   :  { %8 = vsyncpa [#allocation3], 0  ;;  %s2903_s0 = inlined_call_operand.hbm [shape: f32[4,8,8,16], index: 0, kind: input, shape index: {}]   ;;  %s2904_s1 = inlined_call_operand.hbm [shape: f32[112,128], index: 1, kind: input, shape index: {}]   ;;  %s2905_s2 = inlined_call_operand.hbm [shape: f32[8,128], index: 2, kind: input, shape index: {}]   ;;  %s2906_s3 = inlined_call_operand.hbm [shape: f32[4,1,8], index: 3, kind: output, shape index: {}]  }
   0x1   :  { %10 = vsyncpa [#allocation3 + $0x1], 0 }
   0x2   :  { %11 = vsyncpa [#allocation6], 0 }
   0x3   :  { %12 = vsyncpa [#allocation4], 0 }
   0x4   :  { %14 = vsyncpa [#allocation4 + $0x1], 0  ;;  %s2451_s12 = smov 0   ;;  %s2453_s13 = smov 0  }
   0x5   :  { %s2455_s14 = smov 0   ;;  %s2457_s15 = smov 0  }
   0x6 LB: > { %s2472_s16 = sadd.s32 4294967295, %s2418_s15   ;;  %s1792_s17 = sadd.s32 4294967294, %s2418_s15   ;;  %s2418_s15 = sphi %s2457_s15, %s2925_s15   ;;  %s2414_s14 = sphi %s2455_s14, %s2924_s14   ;;  %s2410_s13 = sphi %s2453_s13, %s2923_s13   ;;  %s2406_s12 = sphi %s2451_s12, %s2922_s12  }
   0x7   : > { %p40_p0 = scmp.ne.s32.totalorder %s2410_s13, %s2406_s12  ;;  %p2907_p1 = scmp.eq.s32.totalorder %s2472_s16, 0 }
   0x8   : > { %p112_p3 = scmp.eq.s32.totalorder %s1792_s17, 3  ;;  %p1793_p5 = scmp.ge.s32.totalorder %s2418_s15, 1 }
   0x9   : > { %p2481_p4 = por %p2907_p1, %p40_p0  ;;  %p119_p7 = scmp.lt.s32.totalorder %s2418_s15, 5 }
   0xa   : > { %p2486_p6 = por %p112_p3, %p40_p0  ;;  %s2420_s21 = smov [#allocation5]  }
   0xb   : > { %s2910_s18 = scalar_select %p2481_p4, 1, 0 }
   0xc   : > { %s2911_s19 = scalar_select %p2486_p6, 1, 0 }
   0xd   : > { %p2491_p8 = pnand %p1793_p5, %p119_p7  ;;  %s131_s22 = sshll.u32 %s2420_s21, 4  ;;  %s132_s22 = int_to_ptr.vmem [resolvable:$true] %s131_s22 }
   0xe   : > { %s2421_s24 = smov [#allocation7]   ;;  %s2262_s28 = scalar_lea.hbm %s2904_s1, 1792 }
   0xf   : > { %s2912_s20 = scalar_select %p2491_p8, 1, 0 }
  0x10   : > { %p2124_p9 = pneg %p2491_p8  ;;  %s145_s25 = sshll.u32 %s2421_s24, 4  ;;  %s2503_s25 = int_to_ptr.vmem [resolvable:$true] %s145_s25 }
  0x11   : > { %p2263_p11 = scmp.ne.s32.totalorder %s2904_s1, %s2262_s28  ;;  %p2269_p3 = scmp.lt.u32.totalorder %s2262_s28, %s2904_s1 }
  0x12   : > { %p2499_p10 = pnand %p2124_p9, %p2907_p1 }
  0x14   : > { %p2264_p12 = pneg %p2499_p10 }
  0x16   : > { %p2265_p13 = pnand %p2264_p12, %p2263_p11 }
  0x18   : > { %p2266_p0 = pneg %p2265_p13 }
  0x1a   : > { %p2271_p5 = pnand %p2269_p3, %p2266_p0 }
  0x1c   : > { %2274 = shalt.err (!%p2271_p5)
}
  0x1d   : > { %s2275_s6 = scalar_lea.vmem %s132_s22, 1792  ;;  %p2283_p2 = scmp.lt.s32.totalorder %s132_s22, %s132_s22 }
  0x1e   : > { %p2276_p7 = scmp.ne.s32.totalorder %s132_s22, %s2275_s6  ;;  %p2284_p6 = scmp.lt.s32.totalorder %s2275_s6, %s2275_s6 }
  0x20   : > { %p2278_p9 = pnand %p2276_p7, %p2264_p12  ;;  %p2285_p4 = por %p2284_p6, %p2283_p2 }
  0x22   : > { %p2279_p1 = pneg %p2278_p9 }
  0x24   : > { %p2286_p8 = pnand %p2285_p4, %p2279_p1 }
  0x26   : > { %2289 = shalt.err (!%p2286_p8)
}
  0x27   : > { %s2422_s7 = smov 128   ;;  %s2423_s8 = smov 8  }
  0x28   : > { %2127 = dma.hbm_to_vmem [thread:$0]  (!%p2499_p10), %s2904_s1, 1792, %s132_s22, [#allocation6], %s2422_s7, %s2422_s7, %s2423_s8  }
  0x29   : > { %s2290_s21 = scalar_lea.hbm %s2905_s2, 128 }
  0x2a   : > { %p2291_p1 = scmp.ne.s32.totalorder %s2905_s2, %s2290_s21  ;;  %p2297_p6 = scmp.lt.u32.totalorder %s2290_s21, %s2905_s2 }
  0x2c   : > { %p2293_p2 = pnand %p2291_p1, %p2264_p12 }
  0x2e   : > { %p2294_p4 = pneg %p2293_p2 }
  0x30   : > { %p2299_p8 = pnand %p2297_p6, %p2294_p4 }
  0x32   : > { %2302 = shalt.err (!%p2299_p8)
}
  0x33   : > { %s2303_s22 = scalar_lea.vmem %s2503_s25, 128  ;;  %p2311_p3 = scmp.lt.s32.totalorder %s2503_s25, %s2503_s25 }
  0x34   : > { %p2304_p11 = scmp.ne.s32.totalorder %s2503_s25, %s2303_s22  ;;  %p2312_p5 = scmp.lt.s32.totalorder %s2303_s22, %s2303_s22 }
  0x36   : > { %p2306_p13 = pnand %p2304_p11, %p2264_p12  ;;  %p2313_p7 = por %p2312_p5, %p2311_p3 }
  0x38   : > { %p2307_p0 = pneg %p2306_p13 }
  0x3a   : > { %p2314_p9 = pnand %p2313_p7, %p2307_p0 }
  0x3c   : > { %2317 = shalt.err (!%p2314_p9)
}
  0x3d   : > { %2130 = dma.hbm_to_vmem [thread:$0]  (!%p2499_p10), %s2905_s2, 128, %s2503_s25, [#allocation6]  }
  0x3e   : > { %s2556_s4 = sadd.s32 1, %s2418_s15   ;;  %s27_s23 = sadd.s32 1, %s2414_s14 }
  0x3f   : > { %s24_s5 = ssub.s32 %s2418_s15, %s2556_s4  ;;  %p34_p12 = scmp.ne.s32.totalorder %s2414_s14, %s2410_s13 }
  0x40   : > { %p25_p1 = scmp.eq.s32.totalorder %s24_s5, 0  ;;  %p35_p2 = scmp.eq.s32.totalorder %s2418_s15, 0 }
  0x41   : > { %p2914_p4 = scmp.eq.s32.totalorder %s2472_s16, 3  ;;  %p2141_p8 = scmp.lt.s32.totalorder %s2418_s15, 4 }
  0x42   : > { %s2572_s9 = scalar_select %p25_p1, %s2414_s14, %s27_s23  }
  0x43   : > { %p2566_p6 = por %p2914_p4, %p34_p12  ;;  %p36_p11 = por %p35_p2, %p34_p12 }
  0x44   : > { %s156_s10 = sand.u32 1, %s2414_s14   ;;  %s1841_s25 = sshll.u32 %s2418_s15, 10 }
  0x45   : > { %s1797_s11 = sshll.u32 %s156_s10, 6  ;;  %s2579_s24 = scalar_lea.hbm %s2903_s0, %s1841_s25 }
  0x46   : > { %s160_s26 = scalar_lea.vmem [#allocation2], %s1797_s11  ;;  %p2583_p10 = pnand %p2141_p8, %p36_p11 }
  0x47   : > { %s167_s27 = sshll.u32 %s160_s26, 4  ;;  %s2587_s22 = scalar_lea.sflag [#allocation3], %s156_s10  ;;  %s2581_s27 = int_to_ptr.vmem [resolvable:$true] %s167_s27 }
  0x48   : > { %s2318_s29 = scalar_lea.hbm %s2579_s24, 1024  ;;  %p2320_p0 = pneg %p2583_p10 }
  0x49   : > { %p2319_p13 = scmp.ne.s32.totalorder %s2579_s24, %s2318_s29  ;;  %s2323_s5 = scalar_lea.hbm %s2903_s0, 4096 }
  0x4a   : > { %p2324_p7 = scmp.lt.u32.totalorder %s2579_s24, %s2903_s0  ;;  %p2325_p9 = scmp.lt.u32.totalorder %s2323_s5, %s2318_s29 }
  0x4b   : > { %p2321_p3 = pnand %p2320_p0, %p2319_p13  ;;  %p2327_p1 = scmp.lt.u32.totalorder %s2318_s29, %s2579_s24 }
  0x4c   : > { %p2326_p12 = por %p2325_p9, %p2324_p7 }
  0x4d   : > { %p2322_p5 = pneg %p2321_p3 }
  0x4e   : > { %p2328_p2 = por %p2327_p1, %p2326_p12 }
  0x50   : > { %p2329_p4 = pnand %p2328_p2, %p2322_p5 }
  0x52   : > { %2332 = shalt.err (!%p2329_p4)
}
  0x53   : > { %s2333_s10 = scalar_lea.vmem %s2581_s27, 1024  ;;  %s2424_s17 = smov [#allocation2]  }
  0x54   : > { %p2334_p8 = scmp.ne.s32.totalorder %s2581_s27, %s2333_s10  ;;  %s2338_s21 = sshll.u32 %s2424_s17, 4  ;;  %s2339_s21 = int_to_ptr.vmem [resolvable:$false] %s2338_s21 }
  0x55   : > { %s2340_s26 = scalar_lea.vmem %s2339_s21, 2048  ;;  %p2341_p3 = scmp.lt.s32.totalorder %s2581_s27, %s2339_s21 }
  0x56   : > { %p2336_p11 = pnand %p2334_p8, %p2320_p0  ;;  %p2342_p7 = scmp.lt.s32.totalorder %s2340_s26, %s2333_s10 }
  0x58   : > { %p2337_p13 = pneg %p2336_p11  ;;  %p2343_p9 = por %p2342_p7, %p2341_p3 }
  0x5a   : > { %p2344_p12 = pnand %p2343_p9, %p2337_p13 }
  0x5c   : > { %2347 = shalt.err (!%p2344_p12)
}
  0x5d   : > { %2134 = dma.hbm_to_vmem [thread:$0]  (!%p2583_p10), %s2579_s24, 1024, %s2581_s27, %s2587_s22, %s2422_s7, %s2422_s7, %s2423_s8  }
  0x5e   : > { %p2917_p0 = scmp.ne.s32.totalorder %s2912_s20, 0 }
  0x5f   : > { %s2621_s29 = sand.u32 (!%p2917_p0), 1, %s2410_s13   ;;  %p2918_p5 = scmp.ne.s32.totalorder (!%p2917_p0), %s2910_s18, 0 }
  0x60   : > { %179 = sbr.rel (%p2917_p0) target bundleno = 7387 (0x1cdb), region = 32  ;;  %s1801_s30 = sshll.u32 (!%p2917_p0), %s2621_s29, 6 }
  0x61   : > { %s182_s23 = scalar_lea.sflag (!%p2917_p0), [#allocation3], %s2621_s29  ;;  %s2625_s5 = scalar_lea.vmem (!%p2917_p0), [#allocation2], %s1801_s30 }
  0x67   : > { %2393 = dma.done.wait (%p2918_p5), %s182_s23, 1024  }
  0x68   : > { %2395 = vsyncadd (%p2918_p5), %s182_s23, 4294966272  ;;  %p2919_p10 = scmp.eq.s32.totalorder %s2472_s16, 0 }
  0x6a   : > { %2397 = dma.done.wait (%p2919_p10), [#allocation6], 1920   ;;  %p2920_p1 = pmov %p2919_p10 }
  0x6b   : > { %v2425_v0 = vmov 0.0|0.0   ;;  %vm2426_vm0 = vmmov 0   ;;  %v2427_v1 = vmov 0.0   ;;  %vm244_vm1 = vcmask 130048   ;;  %v215_v2 = vld [vmem:[#allocation5] sm:$0xff]  ;;  %v216_v3 = vld [vmem:[#allocation5 + $0x8] sm:$0xff] }
  0x6c   : > { %2399 = vsyncadd (%p2920_p1), [#allocation6], 4294965376  ;;  %2045 = vmatprep.subr.bf16.mxu0 %v2425_v0  ;;  %1911 = vmatprep.mubr.msk.f32.mxu0 %vm2426_vm0, %v2427_v1  ;;  %v2639_v4 = vld [vmem:[%s2625_s5] sm:$0xff]  ;;  %v2046_v5 = vpack.c.bf16 %v216_v3, %v215_v2  ;;  %v2642_v6 = vld [vmem:[%s2625_s5 + $0x8] sm:$0xff]  ;;  %s2428_s18 = smov 64   ;;  %s2429_s20 = smov 32  }
  0x6d   : > { %v2645_v7 = vld [vmem:[%s2625_s5 + $0x10] sm:$0xff]  ;;  %v2648_v8 = vld [vmem:[%s2625_s5 + $0x18] sm:$0xff]  ;;  %v245_v9 = vsel %vm244_vm1, %v2639_v4, 0.0  ;;  %v2653_v10 = vld [vmem:[%s2625_s5 + $0x20] sm:$0xff]  ;;  %v246_v11 = vsel %vm244_vm1, %v2642_v6, 0.0  ;;  %v268_v13 = vmul.f32 %v2639_v4, %v2639_v4  ;;  %v269_v14 = vmul.f32 %v2642_v6, %v2642_v6  ;;  %s1838_s7 = sshll.u32 %s2472_s16, 4 }
  0x6e   : > { %v248_v12 = vsel %vm244_vm1, %v2645_v7, 0.0  ;;  %2047 = vmatpush3.bf16.msra.mxu0 %v2046_v5  ;;  %2049 = vmatprep.subr.bf16.mxu1 %v2046_v5  ;;  %v247_v15 = vadd.f32 %v246_v11, %v245_v9  ;;  %v250_v16 = vsel %vm244_vm1, %v2648_v8, 0.0  ;;  %v270_v17 = vmul.f32 %v2645_v7, %v2645_v7  ;;  %v2671_v19 = vld [vmem:[%s2625_s5 + $0x28] sm:$0xff]  ;;  %v2682_v26 = vld [vmem:[%s2625_s5 + $0x30] sm:$0xff]  ;;  %v2690_v32 = vld [vmem:[%s2625_s5 + $0x38] sm:$0xff]  ;;  %s214_s8 = scalar_lea.vmem [#allocation8], %s2621_s29  ;;  %s2860_s22 = scalar_lea.hbm %s2906_s3, %s1838_s7 }
  0x6f   : > { %2051 = vmatpush3.bf16.msra.mxu1 %v2046_v5  ;;  %2052 = vmatprep.subr.bf16.mxu0 %v2425_v0  ;;  %v271_v18 = vmul.f32 %v2648_v8, %v2648_v8  ;;  %v252_v21 = vsel %vm244_vm1, %v2653_v10, 0.0  ;;  %v272_v22 = vmul.f32 %v2653_v10, %v2653_v10  ;;  %v276_v23 = vsel %vm244_vm1, %v268_v13, 0.0  ;;  %v217_v11 = vld [vmem:[#allocation5 + $0x10] sm:$0xff]  ;;  %s1707_s24 = sshll.u32 %s214_s8, 4  ;;  %s1695_s11 = scalar_lea.sflag [#allocation4], %s2621_s29  ;;  %s2862_s24 = int_to_ptr.vmem [resolvable:$true] %s1707_s24 }
  0x70   : > { %v249_v20 = vadd.f32 %v248_v12, %v247_v15  ;;  %2064 = vmatprep.subr.bf16.mxu1 %v2425_v0  ;;  %v277_v24 = vsel %vm244_vm1, %v269_v14, 0.0  ;;  %v279_v25 = vsel %vm244_vm1, %v270_v17, 0.0  ;;  %v254_v29 = vsel %vm244_vm1, %v2671_v19, 0.0  ;;  %v218_v12 = vld [vmem:[#allocation5 + $0x18] sm:$0xff]  ;;  %s2348_s25 = scalar_lea.vmem %s2862_s24, 16  ;;  %s2430_s16 = smov [#allocation8]  }
  0x71   : > { %v278_v28 = vadd.f32 %v277_v24, %v276_v23  ;;  %v273_v30 = vmul.f32 %v2671_v19, %v2671_v19  ;;  %v281_v31 = vsel %vm244_vm1, %v271_v18, 0.0  ;;  %v256_v35 = vsel %vm244_vm1, %v2682_v26, 0.0  ;;  %v229_v24 = vld [vmem:[#allocation7] sm:$0x1]  ;;  %p2349_p2 = scmp.ne.s32.totalorder %s2862_s24, %s2348_s25  ;;  %s2352_s10 = sshll.u32 %s2430_s16, 4  ;;  %s2353_s10 = int_to_ptr.vmem [resolvable:$false] %s2352_s10 }
  0x72   : > { %v251_v27 = vadd.f32 %v250_v16, %v249_v20  ;;  %v274_v36 = vmul.f32 %v2682_v26, %v2682_v26  ;;  %v283_v37 = vsel %vm244_vm1, %v272_v22, 0.0  ;;  %v258_v40 = vsel %vm244_vm1, %v2690_v32, 0.0  ;;  %v219_v20 = vld [vmem:[#allocation5 + $0x20] sm:$0xff]  ;;  %s2354_s17 = scalar_lea.vmem %s2353_s10, 32  ;;  %p2355_p11 = scmp.lt.s32.totalorder %s2862_s24, %s2353_s10 }
  0x73   : > { %v280_v34 = vadd.f32 %v279_v25, %v278_v28  ;;  %v275_v41 = vmul.f32 %v2690_v32, %v2690_v32  ;;  %v285_v42 = vsel %vm244_vm1, %v273_v30, 0.0  ;;  %v2704_v14 = vpack.c.bf16 %v218_v12, %v217_v11  ;;  %p2350_p4 = pnand %p2349_p2, %p2566_p6  ;;  %p2356_p13 = scmp.lt.s32.totalorder %s2354_s17, %s2348_s25 }
  0x74   : > { %v253_v33 = vadd.f32 %v252_v21, %v251_v27  ;;  %v287_v45 = vsel %vm244_vm1, %v274_v36, 0.0  ;;  %v220_v21 = vld [vmem:[#allocation5 + $0x28] sm:$0xff]  ;;  %vm518_vm2 = vcmask 261120   ;;  %vm1317_vm3 = vcmask 1048320  }
  0x75   : > { %v282_v39 = vadd.f32 %v281_v31, %v280_v34  ;;  %v289_v48 = vsel %vm244_vm1, %v275_v41, 0.0  ;;  %v2713_v22 = vpack.c.bf16 %v220_v21, %v219_v20  ;;  %vm1475_vm5 = vcmask 64512   ;;  %p2351_p8 = pneg %p2350_p4  ;;  %p2357_p3 = por %p2356_p13, %p2355_p11 }
  0x76   : > { %v255_v38 = vadd.f32 %v254_v29, %v253_v33  ;;  %vm1692_vm7 = vcmask 57344  }
  0x77   : > { %v284_v44 = vadd.f32 %v283_v37, %v282_v39  ;;  %p2358_p7 = pnand %p2357_p3, %p2351_p8 }
  0x78   : > { %v257_v43 = vadd.f32 %v256_v35, %v255_v38 }
  0x79   : > { %v286_v47 = vadd.f32 %v285_v42, %v284_v44 }
  0x7a   : > { %v259_v46 = vadd.f32 %v258_v40, %v257_v43 }
  0x7b   : > { %v288_v50 = vadd.f32 %v287_v45, %v286_v47 }
  0x7c   : > { %v260_v49 = vrot.slane %v259_v46, 4 }
  0x7d   : > { %v290_v52 = vadd.f32 %v289_v48, %v288_v50 }
  0x7e   : > { %v261_v51 = vadd.f32 %v260_v49, %v259_v46 }
  0x7f   : > { %v291_v54 = vrot.slane %v290_v52, 4 }
  0x80   : > { %v262_v53 = vrot.slane %v261_v51, 2 }
  0x81   : > { %v292_v56 = vadd.f32 %v291_v54, %v290_v52 }
  0x82   : > { %v263_v55 = vadd.f32 %v262_v53, %v261_v51 }
  0x83   : > { %v293_v58 = vrot.slane %v292_v56, 2 }
  0x84   : > { %v264_v57 = vrot.slane %v263_v55, 1 }
  0x85   : > { %v294_v60 = vadd.f32 %v293_v58, %v292_v56 }
  0x86   : > { %v265_v59 = vadd.f32 %v264_v57, %v263_v55 }
  0x87   : > { %v295_v62 = vrot.slane %v294_v60, 1 }
  0x88   : > { %v267_v61 = vmul.f32 0.015625, %v265_v59 }
  0x89   : > { %v296_v63 = vadd.f32 %v295_v62, %v294_v60 }
  0x8a   : > { %v298_v2 = vmul.f32 %v267_v61, %v267_v61 }
  0x8b   : > { %v297_v3 = vmul.f32 0.015625, %v296_v63 }
  0x8d   : > { %v299_v5 = vsub.f32 %v297_v3, %v298_v2 }
  0x8f   : > { %v300_v9 = vadd.f32 1e-05, %v299_v5 }
  0x91   : > { %2186 = vrsqrt.f32 %v300_v9 }
  0x9b   : > { %v2187_v13 = vpop.eup %2186 }
  0x9c   : > { %v302_v15 = vmul.f32 %v2187_v13, %v267_v61  ;;  %v377_v16 = vmul.f32 %v2187_v13, %v2639_v4  ;;  %v378_v17 = vmul.f32 %v2187_v13, %v2642_v6  ;;  %v379_v18 = vmul.f32 %v2187_v13, %v2645_v7 }
  0x9d   : > { %v380_v23 = vmul.f32 %v2187_v13, %v2648_v8  ;;  %v381_v4 = vmul.f32 %v2187_v13, %v2653_v10  ;;  %v382_v6 = vmul.f32 %v2187_v13, %v2671_v19  ;;  %v383_v7 = vmul.f32 %v2187_v13, %v2682_v26 }
  0x9e   : > { %1912 = vmatmul.mubr.msk.f32.vlgmr.msra.gmra.mrb[0].mxu0 %vm244_vm1, %v302_v15  ;;  %1918 = vmatprep.mubr.msk.f32.mxu1 %vm244_vm1, %v377_v16  ;;  %v384_v8 = vmul.f32 %v2187_v13, %v2690_v32  ;;  %v385_v10 = vlaneseq }
  0x9f   : > { %2054 = vmatpush3.bf16.msra.mxu0 %v2704_v14  ;;  %1919 = vmatmul.mubr.msk.f32.vlgmr.msra.gmra.mrb[0].mxu1 %vm244_vm1, %v378_v17 }
  0xa0   : > { %2055 = vmatprep.subr.bf16.mxu0 %v2425_v0  ;;  %1921 = vmatprep.mubr.msk.f32.mxu1 %vm244_vm1, %v379_v18  ;;  %v2744_v19 = vshrl.u32 %v385_v10, 7 }
  0xa1   : > { %1938 = vmatprep.mubr.msk.f32.mxu0 %vm2426_vm0, %v2427_v1  ;;  %2066 = vmatpush3.bf16.msra.mxu1 %v2704_v14 }
  0xa2   : > { %2067 = vmatprep.subr.bf16.mxu1 %v2425_v0  ;;  %v387_v25 = vsub.s32 0, %v2744_v19  ;;  %v226_v19 = vld [vmem:[#allocation5 + $0x58] sm:$0xff] }
  0xa3   : > { %2057 = vmatpush3.bf16.msra.mxu0 %v2713_v22  ;;  %1922 = vmatmul.mubr.msk.f32.gmra.mrb[2].mxu1 %vm244_vm1, %v380_v23 }
  0xa4   : > { %1924 = vmatprep.mubr.msk.f32.mxu1 %vm244_vm1, %v381_v4  ;;  %2058 = vmatprep.subr.bf16.mxu0 %v2425_v0 }
  0xa5   : > { %2069 = vmatpush3.bf16.msra.mxu1 %v2713_v22 }
  0xa6   : > { %1939 = vmatmul.mubr.f32.vlgmr.msra.gmra.mrb[2].mxu0 %v2427_v1  ;;  %2076 = vmatprep.subr.bf16.mxu1 %v2425_v0 }
  0xa7   : > { %1925 = vmatmul.mubr.msk.f32.gmra.mrb[4].mxu1 %vm244_vm1, %v382_v6  ;;  %2060 = vmatpush3.bf16.msra.mxu0 %v2704_v14 }
  0xa8   : > { %1927 = vmatprep.mubr.msk.f32.mxu1 %vm244_vm1, %v383_v7  ;;  %2061 = vmatprep.subr.bf16.mxu0 %v2425_v0 }
  0xa9   : > { %1949 = vmatprep.mubr.msk.f32.mxu0 %vm2426_vm0, %v2427_v1 }
  0xab   : > { %1928 = vmatmul.mubr.msk.f32.gmra.mrb[6].mxu1 %vm244_vm1, %v384_v8  ;;  %2063 = vmatpush3.bf16.msra.mxu0 %v2713_v22 }
  0xac   : > { %1960 = vmatprep.mubr.msk.f32.mxu1 %vm2426_vm0, %v2427_v1  ;;  %2070 = vmatprep.subr.bf16.mxu0 %v2425_v0 }
 0x171   : > { %v372_v26 = vpop.f32.mrb[0].mxu0 }
 0x172   : > { %v376_v27 = vsub.f32 %v229_v24, %v372_v26  ;;  %v1913_v28 = vpop.f32.mrb[1].mxu0  ;;  %v1920_v29 = vpop.f32.mrb[0].mxu1 }
 0x173   : > { %v479_v30 = vpop.f32.mrb[1].mxu1 }
 0x174   : > { %v388_v31 = vrot.slane %v376_v27, %v387_v25 }
 0x176   : > { %v485_v32 = vadd.f32 %v1920_v29, %v388_v31  ;;  %v480_v33 = vadd.f32 %v479_v30, %v388_v31  ;;  %v1923_v34 = vpop.f32.mrb[2].mxu1 }
 0x177   : > { %v2749_v35 = vadd.f32 %v1923_v34, %v388_v31  ;;  %v489_v36 = vpop.f32.mrb[3].mxu1 }
 0x178   : > { %v2751_v37 = vadd.f32 %v489_v36, %v388_v31 }
 0x179   : > { %v588_v38 = vpop.f32.mrb[2].mxu0 }
 0x17a   : > { %v592_v39 = vadd.f32 %v588_v38, %v480_v33  ;;  %v1940_v40 = vpop.f32.mrb[3].mxu0  ;;  %v1926_v41 = vpop.f32.mrb[4].mxu1 }
 0x17b   : > { %v2753_v42 = vadd.f32 %v1926_v41, %v388_v31  ;;  %v499_v43 = vpop.f32.mrb[5].mxu1 }
 0x17c   : > { %2188 = vtanh.f32 %v592_v39  ;;  %v2755_v44 = vadd.f32 %v499_v43, %v388_v31  ;;  %v1813_v50 = vmul.f32 -1.442695, %v592_v39 }
 0x17e   : > { %v1929_v45 = vpop.f32.mrb[6].mxu1  ;;  %2190 = vpow2.f32 %v1813_v50 }
 0x17f   : > { %v2757_v46 = vadd.f32 %v1929_v45, %v388_v31  ;;  %v509_v47 = vpop.f32.mrb[7].mxu1 }
 0x180   : > { %v2759_v48 = vadd.f32 %v509_v47, %v388_v31 }
 0x186   : > { %v2189_v49 = vpop.eup %2188 }
 0x187   : > { %602 = vrot.lane.b32.xlu0 %v2189_v49, %s2428_s18 }
 0x188   : > { %v2191_v51 = vpop.eup %2190 }
 0x189   : > { %v596_v52 = vadd.f32 1.0, %v2191_v51 }
 0x18b   : > { %2192 = vrcp.f32 %v596_v52 }
 0x195   : > { %v2193_v53 = vpop.eup %2192 }
 0x196   : > { %v600_v56 = vmul.f32 0.0, %v2193_v53 }
 0x1f9   : > { %v603_v54 = vpop.permute.xlu0 %602 }
 0x1fa   : > { %v605_v55 = vmul.f32 %v2193_v53, %v603_v54 }
 0x1fc   : > { %607 = vrot.lane.b32.xlu0 %v605_v55, %s2429_s20 }
 0x26e   : > { %v608_v57 = vpop.permute.xlu0 %607 }
 0x26f   : > { %v610_v58 = vadd.f32 %v608_v57, %v600_v56 }
 0x271   : > { %2194 = vtanh.f32 %v610_v58 }
 0x27b   : > { %v2195_v59 = vpop.eup %2194 }
 0x27c   : > { %613 = vrot.lane.b32.xlu1 %v2195_v59, %s2428_s18 }
 0x2ee   : > { %v614_v60 = vpop.permute.xlu1 %613 }
 0x2ef   : > { %v616_v61 = vmul.f32 %v2193_v53, %v614_v60 }
 0x2f1   : > { %618 = vrot.lane.b32.xlu1 %v616_v61, %s2429_s20 }
 0x363   : > { %v619_v62 = vpop.permute.xlu1 %618 }
 0x364   : > { %1950 = vmatmul.mubr.msk.f32.vlgmr.msra.gmra.mrb[4].mxu0 %vm518_vm2, %v619_v62 }
 0x365   : > { %2072 = vmatpush3.bf16.msra.mxu0 %v2704_v14  ;;  %1971 = vmatprep.mubr.msk.f32.mxu0 %vm2426_vm0, %v2427_v1 }
 0x366   : > { %2073 = vmatprep.subr.bf16.mxu0 %v2425_v0 }
 0x369   : > { %2075 = vmatpush3.bf16.msra.mxu0 %v2713_v22 }
 0x36a   : > { %2082 = vmatprep.subr.bf16.mxu0 %v2425_v0 }
 0x437   : > { %v688_v63 = vpop.f32.mrb[4].mxu0 }
 0x438   : > { %v692_v2 = vadd.f32 %v688_v63, %v485_v32  ;;  %v1951_v3 = vpop.f32.mrb[5].mxu0 }
 0x43a   : > { %2196 = vtanh.f32 %v692_v2  ;;  %v1815_v9 = vmul.f32 -1.442695, %v692_v2 }
 0x43c   : > { %2198 = vpow2.f32 %v1815_v9 }
 0x444   : > { %v2197_v5 = vpop.eup %2196 }
 0x445   : > { %702 = vrot.lane.b32.xlu0 %v2197_v5, %s2428_s18 }
 0x446   : > { %v2199_v11 = vpop.eup %2198 }
 0x447   : > { %v696_v12 = vadd.f32 1.0, %v2199_v11 }
 0x449   : > { %2200 = vrcp.f32 %v696_v12 }
 0x453   : > { %v2201_v13 = vpop.eup %2200 }
 0x454   : > { %v700_v17 = vmul.f32 %v2201_v13, %v610_v58 }
 0x4b7   : > { %v703_v15 = vpop.permute.xlu0 %702 }
 0x4b8   : > { %v705_v16 = vmul.f32 %v2201_v13, %v703_v15 }
 0x4ba   : > { %707 = vrot.lane.b32.xlu1 %v705_v16, %s2429_s20 }
 0x52c   : > { %v708_v18 = vpop.permute.xlu1 %707 }
 0x52d   : > { %v710_v20 = vadd.f32 %v708_v18, %v700_v17 }
 0x52f   : > { %2202 = vtanh.f32 %v710_v20 }
 0x539   : > { %v2203_v21 = vpop.eup %2202 }
 0x53a   : > { %713 = vrot.lane.b32.xlu0 %v2203_v21, %s2428_s18 }
 0x5ac   : > { %v714_v23 = vpop.permute.xlu0 %713 }
 0x5ad   : > { %v716_v4 = vmul.f32 %v2201_v13, %v714_v23 }
 0x5af   : > { %718 = vrot.lane.b32.xlu1 %v716_v4, %s2429_s20 }
 0x621   : > { %v719_v6 = vpop.permute.xlu1 %718 }
 0x622   : > { %1961 = vmatmul.mubr.msk.f32.vlgmr.msra.gmra.mrb[8].mxu1 %vm518_vm2, %v719_v6 }
 0x623   : > { %2078 = vmatpush3.bf16.msra.mxu1 %v2704_v14  ;;  %1982 = vmatprep.mubr.msk.f32.mxu1 %vm2426_vm0, %v2427_v1 }
 0x624   : > { %2079 = vmatprep.subr.bf16.mxu1 %v2425_v0 }
 0x627   : > { %2081 = vmatpush3.bf16.msra.mxu1 %v2713_v22 }
 0x628   : > { %2088 = vmatprep.subr.bf16.mxu1 %v2425_v0 }
 0x6f5   : > { %v788_v7 = vpop.f32.mrb[8].mxu1 }
 0x6f6   : > { %v792_v8 = vadd.f32 %v788_v7, %v2751_v37  ;;  %v1962_v10 = vpop.f32.mrb[9].mxu1 }
 0x6f8   : > { %2204 = vtanh.f32 %v792_v8  ;;  %v1817_v26 = vmul.f32 -1.442695, %v792_v8 }
 0x6fa   : > { %2206 = vpow2.f32 %v1817_v26 }
 0x702   : > { %v2205_v24 = vpop.eup %2204 }
 0x703   : > { %802 = vrot.lane.b32.xlu0 %v2205_v24, %s2428_s18 }
 0x704   : > { %v2207_v27 = vpop.eup %2206 }
 0x705   : > { %v796_v28 = vadd.f32 1.0, %v2207_v27 }
 0x707   : > { %2208 = vrcp.f32 %v796_v28 }
 0x711   : > { %v2209_v29 = vpop.eup %2208 }
 0x712   : > { %v800_v32 = vmul.f32 %v2209_v29, %v710_v20 }
 0x775   : > { %v803_v30 = vpop.permute.xlu0 %802 }
 0x776   : > { %v805_v31 = vmul.f32 %v2209_v29, %v803_v30 }
 0x778   : > { %807 = vrot.lane.b32.xlu1 %v805_v31, %s2429_s20 }
 0x7ea   : > { %v808_v33 = vpop.permute.xlu1 %807 }
 0x7eb   : > { %v810_v34 = vadd.f32 %v808_v33, %v800_v32 }
 0x7ed   : > { %2210 = vtanh.f32 %v810_v34 }
 0x7f7   : > { %v2211_v36 = vpop.eup %2210 }
 0x7f8   : > { %813 = vrot.lane.b32.xlu0 %v2211_v36, %s2428_s18 }
 0x86a   : > { %v814_v37 = vpop.permute.xlu0 %813 }
 0x86b   : > { %v816_v38 = vmul.f32 %v2209_v29, %v814_v37 }
 0x86d   : > { %818 = vrot.lane.b32.xlu1 %v816_v38, %s2429_s20 }
 0x8df   : > { %v819_v39 = vpop.permute.xlu1 %818 }
 0x8e0   : > { %1972 = vmatmul.mubr.msk.f32.vlgmr.msra.gmra.mrb[6].mxu0 %vm518_vm2, %v819_v39 }
 0x8e1   : > { %2084 = vmatpush3.bf16.msra.mxu0 %v2704_v14  ;;  %1993 = vmatprep.mubr.msk.f32.mxu0 %vm2426_vm0, %v2427_v1 }
 0x8e2   : > { %2085 = vmatprep.subr.bf16.mxu0 %v2425_v0 }
 0x8e5   : > { %2087 = vmatpush3.bf16.msra.mxu0 %v2713_v22 }
 0x8e6   : > { %2094 = vmatprep.subr.bf16.mxu0 %v2425_v0 }
 0x9b3   : > { %v888_v40 = vpop.f32.mrb[6].mxu0 }
 0x9b4   : > { %v892_v41 = vadd.f32 %v888_v40, %v2749_v35  ;;  %v1973_v43 = vpop.f32.mrb[7].mxu0 }
 0x9b6   : > { %2212 = vtanh.f32 %v892_v41  ;;  %v1819_v47 = vmul.f32 -1.442695, %v892_v41 }
 0x9b8   : > { %2214 = vpow2.f32 %v1819_v47 }
 0x9c0   : > { %v2213_v45 = vpop.eup %2212 }
 0x9c1   : > { %902 = vrot.lane.b32.xlu0 %v2213_v45, %s2428_s18 }
 0x9c2   : > { %v2215_v49 = vpop.eup %2214 }
 0x9c3   : > { %v896_v50 = vadd.f32 1.0, %v2215_v49 }
 0x9c5   : > { %2216 = vrcp.f32 %v896_v50 }
 0x9cf   : > { %v2217_v51 = vpop.eup %2216 }
 0x9d0   : > { %v900_v54 = vmul.f32 %v2217_v51, %v810_v34 }
 0xa33   : > { %v903_v52 = vpop.permute.xlu0 %902 }
 0xa34   : > { %v905_v53 = vmul.f32 %v2217_v51, %v903_v52 }
 0xa36   : > { %907 = vrot.lane.b32.xlu1 %v905_v53, %s2429_s20 }
 0xaa8   : > { %v908_v55 = vpop.permute.xlu1 %907 }
 0xaa9   : > { %v910_v56 = vadd.f32 %v908_v55, %v900_v54 }
 0xaab   : > { %2218 = vtanh.f32 %v910_v56 }
 0xab5   : > { %v2219_v35 = vpop.eup %2218 }
 0xab6   : > { %913 = vrot.lane.b32.xlu0 %v2219_v35, %s2428_s18 }
 0xb28   : > { %v914_v57 = vpop.permute.xlu0 %913 }
 0xb29   : > { %v916_v58 = vmul.f32 %v2217_v51, %v914_v57 }
 0xb2b   : > { %918 = vrot.lane.b32.xlu1 %v916_v58, %s2429_s20 }
 0xb9d   : > { %v919_v59 = vpop.permute.xlu1 %918 }
 0xb9e   : > { %1983 = vmatmul.mubr.msk.f32.vlgmr.msra.gmra.mrb[10].mxu1 %vm518_vm2, %v919_v59 }
 0xb9f   : > { %2090 = vmatpush3.bf16.msra.mxu1 %v2704_v14  ;;  %2004 = vmatprep.mubr.msk.f32.mxu1 %vm2426_vm0, %v2427_v1 }
 0xba0   : > { %2091 = vmatprep.subr.bf16.mxu1 %v2425_v0 }
 0xba3   : > { %2093 = vmatpush3.bf16.msra.mxu1 %v2713_v22 }
 0xba4   : > { %2100 = vmatprep.subr.bf16.mxu1 %v2425_v0 }
 0xc71   : > { %v988_v60 = vpop.f32.mrb[10].mxu1 }
 0xc72   : > { %v992_v61 = vadd.f32 %v988_v60, %v2755_v44  ;;  %v1984_v62 = vpop.f32.mrb[11].mxu1 }
 0xc74   : > { %2220 = vtanh.f32 %v992_v61  ;;  %v1821_v2 = vmul.f32 -1.442695, %v992_v61 }
 0xc76   : > { %2222 = vpow2.f32 %v1821_v2 }
 0xc7e   : > { %v2221_v63 = vpop.eup %2220 }
 0xc7f   : > { %1002 = vrot.lane.b32.xlu0 %v2221_v63, %s2428_s18 }
 0xc80   : > { %v2223_v3 = vpop.eup %2222 }
 0xc81   : > { %v996_v5 = vadd.f32 1.0, %v2223_v3  ;;  %v221_v3 = vld [vmem:[#allocation5 + $0x30] sm:$0xff] }
 0xc83   : > { %2224 = vrcp.f32 %v996_v5  ;;  %v222_v5 = vld [vmem:[#allocation5 + $0x38] sm:$0xff] }
 0xc8d   : > { %v2225_v9 = vpop.eup %2224 }
 0xc8e   : > { %v1000_v13 = vmul.f32 %v2225_v9, %v910_v56 }
 0xcf1   : > { %v1003_v11 = vpop.permute.xlu0 %1002 }
 0xcf2   : > { %v1005_v12 = vmul.f32 %v2225_v9, %v1003_v11  ;;  %v2101_v11 = vpack.c.bf16 %v222_v5, %v221_v3 }
 0xcf4   : > { %1007 = vrot.lane.b32.xlu1 %v1005_v12, %s2429_s20  ;;  %v224_v12 = vld [vmem:[#allocation5 + $0x48] sm:$0xff] }
 0xd66   : > { %v1008_v15 = vpop.permute.xlu1 %1007 }
 0xd67   : > { %v1010_v16 = vadd.f32 %v1008_v15, %v1000_v13 }
 0xd69   : > { %2226 = vtanh.f32 %v1010_v16 }
 0xd73   : > { %v2227_v44 = vpop.eup %2226 }
 0xd74   : > { %1013 = vrot.lane.b32.xlu0 %v2227_v44, %s2428_s18 }
 0xde6   : > { %v1014_v17 = vpop.permute.xlu0 %1013 }
 0xde7   : > { %v1016_v18 = vmul.f32 %v2225_v9, %v1014_v17  ;;  %v223_v9 = vld [vmem:[#allocation5 + $0x40] sm:$0xff] }
 0xde8   : > { %v2104_v13 = vpack.c.bf16 %v224_v12, %v223_v9  ;;  %v1833_v9 = vld [vmem:[#allocation7 + $0x4] ss:$0 sm:$0xff] }
 0xde9   : > { %1018 = vrot.lane.b32.xlu1 %v1016_v18, %s2429_s20 }
 0xe5b   : > { %v1019_v20 = vpop.permute.xlu1 %1018 }
 0xe5c   : > { %1994 = vmatmul.mubr.msk.f32.vlgmr.msra.gmra.mrb[8].mxu0 %vm518_vm2, %v1019_v20 }
 0xe5d   : > { %2096 = vmatpush3.bf16.msra.mxu0 %v2704_v14  ;;  %2015 = vmatprep.mubr.msk.f32.mxu0 %vm2426_vm0, %v2427_v1 }
 0xe5e   : > { %2097 = vmatprep.subr.bf16.mxu0 %v2425_v0 }
 0xe61   : > { %2099 = vmatpush3.bf16.msra.mxu0 %v2713_v22 }
 0xe62   : > { %2029 = vmatprep.subr.mxu0 %v2427_v1 }
 0xf2f   : > { %v1088_v21 = vpop.f32.mrb[8].mxu0 }
 0xf30   : > { %v1092_v23 = vadd.f32 %v1088_v21, %v2753_v42  ;;  %v1995_v4 = vpop.f32.mrb[9].mxu0 }
 0xf32   : > { %2228 = vtanh.f32 %v1092_v23  ;;  %v1823_v7 = vmul.f32 -1.442695, %v1092_v23 }
 0xf34   : > { %2230 = vpow2.f32 %v1823_v7 }
 0xf3c   : > { %v2229_v6 = vpop.eup %2228 }
 0xf3d   : > { %1102 = vrot.lane.b32.xlu0 %v2229_v6, %s2428_s18 }
 0xf3e   : > { %v2231_v14 = vpop.eup %2230 }
 0xf3f   : > { %v1096_v8 = vadd.f32 1.0, %v2231_v14 }
 0xf41   : > { %2232 = vrcp.f32 %v1096_v8 }
 0xf4b   : > { %v2233_v10 = vpop.eup %2232 }
 0xf4c   : > { %v1100_v22 = vmul.f32 %v2233_v10, %v1010_v16 }
 0xfaf   : > { %v1103_v24 = vpop.permute.xlu0 %1102 }
 0xfb0   : > { %v1105_v26 = vmul.f32 %v2233_v10, %v1103_v24 }
 0xfb2   : > { %1107 = vrot.lane.b32.xlu1 %v1105_v26, %s2429_s20 }
0x1024   : > { %v1108_v27 = vpop.permute.xlu1 %1107 }
0x1025   : > { %v1110_v28 = vadd.f32 %v1108_v27, %v1100_v22 }
0x1027   : > { %2234 = vtanh.f32 %v1110_v28 }
0x1031   : > { %v2235_v42 = vpop.eup %2234 }
0x1032   : > { %1113 = vrot.lane.b32.xlu0 %v2235_v42, %s2428_s18 }
0x10a4   : > { %v1114_v29 = vpop.permute.xlu0 %1113 }
0x10a5   : > { %v1116_v30 = vmul.f32 %v2233_v10, %v1114_v29 }
0x10a7   : > { %1118 = vrot.lane.b32.xlu1 %v1116_v30, %s2429_s20 }
0x1119   : > { %v1119_v31 = vpop.permute.xlu1 %1118 }
0x111a   : > { %2005 = vmatmul.mubr.msk.f32.vlgmr.msra.gmra.mrb[12].mxu1 %vm518_vm2, %v1119_v31 }
0x111b   : > { %2026 = vmatprep.mubr.msk.f32.mxu1 %vm2426_vm0, %v2427_v1  ;;  %2102 = vmatpush3.bf16.msra.mxu1 %v2101_v11 }
0x111c   : > { %2103 = vmatprep.subr.bf16.mxu1 %v2425_v0 }
0x111f   : > { %2105 = vmatpush3.bf16.msra.mxu1 %v2104_v13 }
0x1120   : > { %2106 = vmatprep.subr.bf16.mxu1 %v2425_v0 }
0x11ed   : > { %v1188_v32 = vpop.f32.mrb[12].mxu1 }
0x11ee   : > { %v1192_v33 = vadd.f32 %v1188_v32, %v2759_v48  ;;  %v2006_v34 = vpop.f32.mrb[13].mxu1 }
0x11f0   : > { %2236 = vtanh.f32 %v1192_v33  ;;  %v1825_v37 = vmul.f32 -1.442695, %v1192_v33  ;;  %v1828_v33 = vld [vmem:[#allocation7 + $0x1] ss:$0 sm:$0xff] }
0x11f2   : > { %2238 = vpow2.f32 %v1825_v37  ;;  %v1830_v37 = vld [vmem:[#allocation7 + $0x2] ss:$0 sm:$0xff] }
0x11fa   : > { %v2237_v36 = vpop.eup %2236 }
0x11fb   : > { %1202 = vrot.lane.b32.xlu0 %v2237_v36, %s2428_s18  ;;  %v1831_v36 = vld [vmem:[#allocation7 + $0x3] ss:$0 sm:$0xff] }
0x11fc   : > { %v2239_v38 = vpop.eup %2238 }
0x11fd   : > { %v1196_v39 = vadd.f32 1.0, %v2239_v38 }
0x11ff   : > { %2240 = vrcp.f32 %v1196_v39 }
0x1209   : > { %v2241_v40 = vpop.eup %2240 }
0x120a   : > { %v1200_v45 = vmul.f32 %v2241_v40, %v1110_v28 }
0x126d   : > { %v1203_v41 = vpop.permute.xlu0 %1202 }
0x126e   : > { %v1205_v43 = vmul.f32 %v2241_v40, %v1203_v41 }
0x1270   : > { %1207 = vrot.lane.b32.xlu1 %v1205_v43, %s2429_s20 }
0x12e2   : > { %v1208_v47 = vpop.permute.xlu1 %1207 }
0x12e3   : > { %v1210_v49 = vadd.f32 %v1208_v47, %v1200_v45 }
0x12e5   : > { %2242 = vtanh.f32 %v1210_v49 }
0x12ef   : > { %v2243_v48 = vpop.eup %2242 }
0x12f0   : > { %1213 = vrot.lane.b32.xlu0 %v2243_v48, %s2428_s18 }
0x1362   : > { %v1214_v50 = vpop.permute.xlu0 %1213 }
0x1363   : > { %v1216_v51 = vmul.f32 %v2241_v40, %v1214_v50 }
0x1365   : > { %1218 = vrot.lane.b32.xlu1 %v1216_v51, %s2429_s20 }
0x13d7   : > { %v1219_v52 = vpop.permute.xlu1 %1218 }
0x13d8   : > { %2016 = vmatmul.mubr.msk.f32.vlgmr.msra.gmra.mrb[10].mxu0 %vm518_vm2, %v1219_v52 }
0x13d9   : > { %2031 = vmatprep.mubr.msk.f32.mxu0 %vm2426_vm0, %v2427_v1 }
0x14ab   : > { %v1288_v53 = vpop.f32.mrb[10].mxu0 }
0x14ac   : > { %v1292_v54 = vadd.f32 %v1288_v53, %v2757_v46  ;;  %v2017_v55 = vpop.f32.mrb[11].mxu0 }
0x14ae   : > { %2244 = vtanh.f32 %v1292_v54  ;;  %v1827_v35 = vmul.f32 -1.442695, %v1292_v54 }
0x14b0   : > { %2246 = vpow2.f32 %v1827_v35 }
0x14b8   : > { %v2245_v56 = vpop.eup %2244 }
0x14b9   : > { %1302 = vrot.lane.b32.xlu0 %v2245_v56, %s2428_s18 }
0x14ba   : > { %v2247_v57 = vpop.eup %2246 }
0x14bb   : > { %v1296_v58 = vadd.f32 1.0, %v2247_v57 }
0x14bd   : > { %2248 = vrcp.f32 %v1296_v58  ;;  %v225_v58 = vld [vmem:[#allocation5 + $0x50] sm:$0xff] }
0x14c7   : > { %v2249_v59 = vpop.eup %2248 }
0x14c8   : > { %v1300_v62 = vmul.f32 %v2249_v59, %v1210_v49 }
0x152b   : > { %v1303_v60 = vpop.permute.xlu0 %1302 }
0x152c   : > { %v1305_v61 = vmul.f32 %v2249_v59, %v1303_v60 }
0x152e   : > { %1307 = vrot.lane.b32.xlu1 %v1305_v61, %s2429_s20 }
0x15a0   : > { %v1308_v63 = vpop.permute.xlu1 %1307 }
0x15a1   : > { %v1310_v2 = vadd.f32 %v1308_v63, %v1300_v62  ;;  %v227_v62 = vld [vmem:[#allocation5 + $0x60] sm:$0xff]  ;;  %v228_v63 = vld [vmem:[#allocation5 + $0x68] sm:$0xff] }
0x15a3   : > { %2250 = vtanh.f32 %v1310_v2  ;;  %v2110_v2 = vpack.c.bf16 %v228_v63, %v227_v62 }
0x15ad   : > { %v2251_v46 = vpop.eup %2250 }
0x15ae   : > { %1313 = vrot.lane.b32.xlu0 %v2251_v46, %s2428_s18 }
0x1620   : > { %v1314_v15 = vpop.permute.xlu0 %1313 }
0x1621   : > { %v1316_v16 = vmul.f32 %v2249_v59, %v1314_v15  ;;  %v1835_v15 = vld [vmem:[#allocation7 + $0x5] ss:$0 sm:$0xff] }
0x1623   : > { %v1318_v44 = vsel %vm1317_vm3, %v1316_v16, 0.0 }
0x1624   : > { %v1319_v17 = vrot.slane %v1318_v44, 4 }
0x1626   : > { %v1320_v18 = vadd.f32 %v1319_v17, %v1318_v44 }
0x1628   : > { %v1321_v20 = vrot.slane %v1320_v18, 2 }
0x162a   : > { %v1322_v21 = vadd.f32 %v1321_v20, %v1320_v18  ;;  %v1836_v18 = vld [vmem:[#allocation7 + $0x6] ss:$0 sm:$0xff] }
0x162c   : > { %v1323_v23 = vrot.slane %v1322_v21, 1 }
0x162e   : > { %v1324_v4 = vadd.f32 %v1323_v23, %v1322_v21 }
0x1630   : > { %v1326_v6 = vmul.f32 0.125, %v1324_v4 }
0x1632   : > { %v1327_v7 = vsub.f32 %v1316_v16, %v1326_v6 }
0x1634   : > { %v1328_v14 = vmul.f32 %v1327_v7, %v1327_v7 }
0x1636   : > { %v1329_v8 = vsel %vm1317_vm3, %v1328_v14, 0.0 }
0x1637   : > { %v1330_v10 = vrot.slane %v1329_v8, 4 }
0x1639   : > { %v1331_v24 = vadd.f32 %v1330_v10, %v1329_v8 }
0x163b   : > { %v1332_v26 = vrot.slane %v1331_v24, 2 }
0x163d   : > { %v1333_v22 = vadd.f32 %v1332_v26, %v1331_v24 }
0x163f   : > { %v1334_v27 = vrot.slane %v1333_v22, 1 }
0x1641   : > { %v1335_v28 = vadd.f32 %v1334_v27, %v1333_v22 }
0x1643   : > { %v1336_v42 = vmul.f32 0.125, %v1335_v28 }
0x1645   : > { %v1337_v29 = vadd.f32 1e-05, %v1336_v42 }
0x1647   : > { %2252 = vrsqrt.f32 %v1337_v29 }
0x1651   : > { %v2253_v30 = vpop.eup %2252 }
0x1652   : > { %v1339_v31 = vmul.f32 %v2253_v30, %v1327_v7 }
0x1654   : > { %1345 = vrot.lane.b32.xlu1 %v1339_v31, %s2429_s20 }
0x16c6   : > { %v1346_v32 = vpop.permute.xlu1 %1345 }
0x16c7   : > { %2027 = vmatmul.mubr.msk.f32.vlgmr.msra.gmra.mrb[14].mxu1 %vm518_vm2, %v1346_v32  ;;  %2030 = vmatpush3.msra.mxu0 %v1346_v32 }
0x16c8   : > { %2042 = vmatprep.mubr.msk.f32.mxu1 %vm2426_vm0, %v2427_v1 }
0x179a   : > { %v1415_v34 = vpop.f32.mrb[14].mxu1 }
0x179b   : > { %v1416_v38 = vadd.f32 %v1828_v33, %v1415_v34  ;;  %v2028_v39 = vpop.f32.mrb[15].mxu1 }
0x179d   : > { %v1431_v40 = vmul.f32 %v1831_v36, %v1416_v38  ;;  %v1423_v41 = vmul.f32 %v1830_v37, %v1416_v38 }
0x179f   : > { %v1432_v43 = vsel %vm518_vm2, %v1431_v40, 0.0  ;;  %v1424_v45 = vsel %vm518_vm2, %v1423_v41, 0.0 }
0x17a0   : > { %1433 = vadd.xlane.f32.xlu1 %v1432_v43  ;;  %1425 = vadd.xlane.f32.xlu0 %v1424_v45 }
0x182d   : > { %v1426_v47 = vpop.xlane.xlu0 %1425  ;;  %v1434_v48 = vpop.xlane.xlu1 %1433 }
0x182e   : > { %1435 = vxpose.xlu0.b32.start.end [1/1] (short) (narrow) %v1426_v47, 8 }
0x18ae   : > { %v1451_v49 = vpop.trf.xlu0 }
0x18af   : > { %v1470_v1 = vrot.slane %v1451_v49, %v387_v25  ;;  %v2107_v25 = vpack.c.bf16 %v226_v19, %v225_v58 }
0x18b1   : > { %v1471_v50 = vadd.f32 %v1470_v1, %v1434_v48  ;;  %2108 = vmatpush3.bf16.msra.mxu1 %v2107_v25 }
0x18b2   : > { %2109 = vmatprep.subr.bf16.mxu1 %v2425_v0 }
0x18b3   : > { %vm1472_vm4 = vcmp.gt.f32.partialorder %v1471_v50, 0.0  ;;  %v1473_v51 = vmul.f32 0.01, %v1471_v50 }
0x18b5   : > { %v1474_v52 = vsel %vm1472_vm4, %v1471_v50, %v1473_v51  ;;  %2111 = vmatpush3.bf16.msra.mxu1 %v2110_v2 }
0x18b6   : > { %v1476_v53 = vsel %vm1475_vm5, %v1474_v52, -inf }
0x18b7   : > { %1477 = vmax.xlane.f32.xlu1 %v1476_v53 }
0x1944   : > { %v1478_v54 = vpop.xlane.xlu1 %1477 }
0x1945   : > { %v1479_v55 = vsub.f32 %v1474_v52, %v1478_v54 }
0x1947   : > { %v1480_v56 = vmul.f32 1.442695, %v1479_v55 }
0x1949   : > { %2254 = vpow2.f32 %v1480_v56 }
0x1953   : > { %v2255_v35 = vpop.eup %2254 }
0x1954   : > { %v1482_v57 = vsel %vm1475_vm5, %v2255_v35, 0.0 }
0x1955   : > { %1483 = vadd.xlane.f32.xlu1 %v1482_v57 }
0x19e2   : > { %v1484_v59 = vpop.xlane.xlu1 %1483 }
0x19e3   : > { %2256 = vrcp.f32 %v1484_v59 }
0x19ed   : > { %v2257_v60 = vpop.eup %2256 }
0x19ee   : > { %v1486_v61 = vmul.f32 %v2257_v60, %v2255_v35 }
0x19f0   : > { %2032 = vmatmul.mubr.msk.f32.vlgmr.msra.gmra.mrb[12].mxu0 %vm1475_vm5, %v1486_v61 }
0x1ac3   : > { %v1557_v46 = vpop.f32.mrb[12].mxu0 }
0x1ac4   : > { %v1558_v3 = vadd.f32 %v1557_v46, %v1346_v32  ;;  %v2033_v5 = vpop.f32.mrb[13].mxu0 }
0x1ac6   : > { %2043 = vmatmul.mubr.msk.f32.vlgmr.msra.gmra.mrb[16].mxu1 %vm518_vm2, %v1558_v3 }
0x1b99   : > { %v1634_v11 = vpop.f32.mrb[16].mxu1 }
0x1b9a   : > { %v1635_v12 = vadd.f32 %v1833_v9, %v1634_v11  ;;  %v2044_v13 = vpop.f32.mrb[17].mxu1 }
0x1b9c   : > { %vm1638_vm6 = vcmp.gt.f32.partialorder %v1635_v12, 0.0  ;;  %v1639_v0 = vmul.f32 0.01, %v1635_v12 }
0x1b9e   : > { %v1640_v16 = vsel %vm1638_vm6, %v1635_v12, %v1639_v0 }
0x1b9f   : > { %v1645_v44 = vmul.f32 %v1835_v15, %v1640_v16 }
0x1ba1   : > { %v1646_v17 = vsel %vm518_vm2, %v1645_v44, 0.0 }
0x1ba2   : > { %1647 = vadd.xlane.f32.xlu1 %v1646_v17 }
0x1c2f   : > { %v1648_v20 = vpop.xlane.xlu1 %1647 }
0x1c30   : > { %v1653_v21 = vadd.f32 %v1836_v18, %v1648_v20 }
0x1c32   : > { %v1837_v23 = vmul.f32 -1.442695, %v1653_v21 }
0x1c34   : > { %2258 = vpow2.f32 %v1837_v23 }
0x1c3e   : > { %v2259_v4 = vpop.eup %2258 }
0x1c3f   : > { %v1657_v6 = vadd.f32 1.0, %v2259_v4 }
0x1c41   : > { %2260 = vrcp.f32 %v1657_v6 }
0x1c4b   : > { %v2261_v7 = vpop.eup %2260 }
0x1c4c   : > { %1660 = vxpose.xlu1.b32.start.end [1/1] (short) (narrow) %v2261_v7, 8 }
0x1ccc   : > { %v1676_v14 = vpop.trf.xlu1 }
0x1ccd   : > { %1693 = vst.msk [vmem:[%s214_s8] sm:$0x1] %vm1692_vm7, %v1676_v14 }
0x1cce   : > { %2361 = shalt.err (!%p2358_p7)
}
0x1ccf   : > { %s2362_s21 = scalar_lea.hbm %s2860_s22, 16  ;;  %s2366_s30 = scalar_lea.hbm %s2906_s3, 64 }
0x1cd0   : > { %p2363_p9 = scmp.ne.s32.totalorder %s2860_s22, %s2362_s21  ;;  %p2367_p5 = scmp.lt.u32.totalorder %s2860_s22, %s2906_s3 }
0x1cd1   : > { %p2368_p10 = scmp.lt.u32.totalorder %s2366_s30, %s2362_s21  ;;  %p2370_p2 = scmp.lt.u32.totalorder %s2362_s21, %s2860_s22 }
0x1cd2   : > { %p2364_p12 = pnand %p2363_p9, %p2566_p6 }
0x1cd3   : > { %p2369_p1 = por %p2368_p10, %p2367_p5 }
0x1cd4   : > { %p2365_p0 = pneg %p2364_p12 }
0x1cd5   : > { %p2371_p4 = por %p2370_p2, %p2369_p1 }
0x1cd7   : > { %p2372_p8 = pnand %p2371_p4, %p2365_p0 }
0x1cd9   : > { %2375 = shalt.err (!%p2372_p8)
}
0x1cda   : > { %2122 = dma.vmem_to_hbm [thread:$0]  (%p2566_p6), %s2862_s24, 16, %s2860_s22, %s1695_s11  }
0x1cdb PF: > { %p2144_p11 = scmp.ge.s32.totalorder %s2418_s15, 2  ;;  %s1719_s18 = sand.u32 1, %s2406_s12  }
0x1cdc   : > { %p2921_p13 = scmp.ne.s32.totalorder %s2911_s19, 0  ;;  %s1720_s20 = scalar_lea.sflag [#allocation4], %s1719_s18 }
0x1cde   : > { %p2136_p3 = pnand %p2144_p11, %p2921_p13 }
0x1ce0   : > { %2401 = dma.done.wait (!%p2136_p3), %s1720_s20, 16  }
0x1ce1   : > { %2403 = vsyncadd (!%p2136_p3), %s1720_s20, 4294967280  ;;  %p17_p7 = scmp.ge.s32.totalorder %s2556_s4, 6   ;;  %s2922_s12 = smov %s2410_s13 }
0x1ce2   : > { %s2923_s13 = smov %s2414_s14  ;;  %s2924_s14 = smov %s2572_s9 }
0x1ce3   : > { %s2925_s15 = smov %s2556_s4  ;;  %19 = sbr.rel (!%p17_p7) target bundleno = 6 (0x6), region = 85 }
0x1cea   :  { %1724 = vsyncpa [#allocation3], 1 }
0x1ceb   :  { %1726 = vsyncpa [#allocation3 + $0x1], 1 }
0x1cec   :  { %1727 = vsyncpa [#allocation6], 1 }
0x1ced   :  { %1728 = vsyncpa [#allocation4], 1 }
0x1cee   :  { %1730 = vsyncpa [#allocation4 + $0x1], 1 }

</bundles_post_ra>
